<compile_context>
chip_gen: v5e
topology: v5e:2x2
jax: 0.10.0
libtpu: 0.0.40
codegen_flags: <defaults>
</compile_context>

<pallas_src>
import functools
import math

import jax
import jax.numpy as jnp
from jax.experimental import pallas as pl
from jax.experimental.pallas import tpu as pltpu

_PRECISION = jax.lax.Precision.DEFAULT  # same precision for kernel + reference


def _softplus(x):
    # PyTorch F.softplus with threshold=20
    return jnp.where(x > 20.0, x, jnp.log1p(jnp.exp(jnp.minimum(x, 20.0))))


def vrnn_compute_zs_kernel(
    hc_ref, fs_ref, eps_ref,
    wqnet_ref, bqnet_ref,       # (Dmix, E), (1, E)
    wqpri_ref, bqpri_ref,       # (E, E+2L), (1, E+2L)   fused [W_q_attn | W_prior]
    wkv_ref, bkv_ref,           # (Df, 2E), (1, 2E)      fused [W_k | W_v]
    wo_ref, bo_ref,             # (E, E), (1, E)
    wpost_ref, bpost_ref,       # (E, 2L), (1, 2L)
    wtr_ref, btr_ref,           # (L, Dz), (1, Dz)
    out_ref,                    # (Bb, T, E+Dz+5L+M) packed output slab
    *, num_heads, dim_latent, dim_query,
    pz_mult, qz_mult, pz_std_mult, qz_std_mult, pz_min_std, qz_min_std):
    f32 = jnp.float32
    E, L = dim_query, dim_latent
    Bb, T, Dmix = hc_ref.shape
    M = fs_ref.shape[1]
    hd = E // num_heads
    scale = 1.0 / math.sqrt(hd)

    def mm(x, w_ref, b_ref):
        return (jnp.dot(x, w_ref[...], preferred_element_type=f32,
                        precision=_PRECISION) + b_ref[...])

    # ---- net_query: Linear + ReLU on [attn_hs | attn_cs] (rows = Bb*T) ----
    mix = hc_ref[...].reshape(Bb * T, Dmix)
    q = jnp.maximum(mm(mix, wqnet_ref, bqnet_ref), 0.0)          # (Bb*T, E)

    # ---- fused attention-query projection + prior net ----
    qp_pri = mm(q, wqpri_ref, bqpri_ref)                         # (Bb*T, E+2L)
    qp = qp_pri[:, :E]
    pz_mean = qp_pri[:, E:E + L]
    pz_std = jnp.maximum(_softplus(qp_pri[:, E + L:]), pz_min_std)

    # ---- fused key/value projections of fs ----
    fsb = fs_ref[...].reshape(Bb * M, fs_ref.shape[2])
    kv = mm(fsb, wkv_ref, bkv_ref)                               # (Bb*M, 2E)
    kp = kv[:, :E].reshape(Bb, M, E)
    vp = kv[:, E:].reshape(Bb, M, E)
    qp3 = qp.reshape(Bb, T, E)

    # ---- nn.MultiheadAttention, eval mode (no dropout), need_weights=True ----
    head_outs = []
    w_sum = jnp.zeros((Bb, T, M), dtype=f32)
    for hh in range(num_heads):
        lo = hh * hd
        qh = qp3[:, :, lo:lo + hd] * scale
        kh = kp[:, :, lo:lo + hd]
        vh = vp[:, :, lo:lo + hd]
        sc = jnp.einsum('btd,bmd->btm', qh, kh,
                        preferred_element_type=f32, precision=_PRECISION)
        sc = sc - jnp.max(sc, axis=-1, keepdims=True)
        p = jnp.exp(sc)
        p = p * pl.reciprocal(jnp.sum(p, axis=-1, keepdims=True), approx=True)
        w_sum = w_sum + p
        head_outs.append(jnp.einsum('btm,bmd->btd', p, vh,
                                    preferred_element_type=f32,
                                    precision=_PRECISION))
    attn = jnp.concatenate(head_outs, axis=-1).reshape(Bb * T, E)
    attn_out = mm(attn, wo_ref, bo_ref)
    attn_w = (w_sum * (1.0 / num_heads)).reshape(Bb * T, M)      # mean over heads

    # ---- net_posterior (posterior_type='indep'): ReLU -> Linear ----
    raw_q = mm(jnp.maximum(attn_out, 0.0), wpost_ref, bpost_ref)
    qz_mean = raw_q[:, :L]
    qz_std = jnp.maximum(_softplus(raw_q[:, L:]), qz_min_std)

    # ---- reparameterized sample (noise supplied by host for determinism) ----
    eps = eps_ref[...].reshape(Bb * T, 2 * L)
    sampled = (pz_mult * (pz_mean + pz_std_mult * pz_std * eps[:, :L])
               + qz_mult * (qz_mean + qz_std_mult * qz_std * eps[:, L:]))

    # ---- net_transform: Linear + ReLU (dim_g == 0, no gs concat) ----
    zs = jnp.maximum(mm(sampled, wtr_ref, btr_ref), 0.0)

    # single lane-dense packed write (one output DMA instead of 8 narrow ones)
    slab = jnp.concatenate(
        [q, zs, sampled, pz_mean, pz_std, qz_mean, qz_std, attn_w], axis=-1)
    out_ref[...] = slab.reshape(Bb, T, slab.shape[-1])


def vrnn_compute_zs(attn_hs, attn_cs, fs, eps_p, eps_q, params, *,
                    num_heads=4, pz_mult=0.0, qz_mult=1.0,
                    pz_std_mult=1.0, qz_std_mult=1.0,
                    pz_min_std=0.0, qz_min_std=0.0, num_batch_blocks=None):
    T, B, H = attn_hs.shape
    Dc = attn_cs.shape[-1]
    M, _, Df = fs.shape
    E = params['w_q_net'].shape[0]
    L = params['w_prior'].shape[0] // 2
    Dz = params['w_trans'].shape[0]

    # Grid length defaults to 2 (keeps both v7x TensorCores busy) while still
    # folding B/2 batch rows into every matmul for v5e/v6e utilization.
    if num_batch_blocks is None:
        num_batch_blocks = 2 if (B % 2 == 0 and B >= 2) else 1
    assert B % num_batch_blocks == 0
    Bb = B // num_batch_blocks

    # batch-major, lane-packed inputs
    hc = jnp.transpose(jnp.concatenate([attn_hs, attn_cs], axis=-1), (1, 0, 2))
    fs_b = jnp.transpose(fs, (1, 0, 2))
    eps = jnp.transpose(jnp.concatenate([eps_p, eps_q], axis=-1), (1, 0, 2))

    # pre-transposed / fused weights (host side, trace time — no in-kernel .T)
    w_qnet = params['w_q_net'].T
    b_qnet = params['b_q_net']
    w_qpri = jnp.concatenate([params['w_q'].T, params['w_prior'].T], axis=1)
    b_qpri = jnp.concatenate([params['b_q'], params['b_prior']], axis=1)
    w_kv = jnp.concatenate([params['w_k'].T, params['w_v'].T], axis=1)
    b_kv = jnp.concatenate([params['b_k'], params['b_v']], axis=1)
    weights = [w_qnet, b_qnet, w_qpri, b_qpri, w_kv, b_kv,
               params['w_o'].T, params['b_o'],
               params['w_post'].T, params['b_post'],
               params['w_trans'].T, params['b_trans']]

    OUT = E + Dz + 5 * L + M

    def batch_spec(rows, d):
        return pl.BlockSpec((Bb, rows, d), lambda i: (i, 0, 0))

    def weight_spec(w):
        return pl.BlockSpec(w.shape, lambda i, _nd=w.ndim: (0,) * _nd)

    in_specs = ([batch_spec(T, H + Dc), batch_spec(M, Df), batch_spec(T, 2 * L)]
                + [weight_spec(w) for w in weights])
    out_specs = batch_spec(T, OUT)

    kernel = functools.partial(
        vrnn_compute_zs_kernel, num_heads=num_heads, dim_latent=L, dim_query=E,
        pz_mult=pz_mult, qz_mult=qz_mult,
        pz_std_mult=pz_std_mult, qz_std_mult=qz_std_mult,
        pz_min_std=pz_min_std, qz_min_std=qz_min_std)

    slab = pl.pallas_call(
        kernel,
        out_shape=jax.ShapeDtypeStruct((B, T, OUT), jnp.float32),
        grid_spec=pltpu.PrefetchScalarGridSpec(
            num_scalar_prefetch=0, grid=(num_batch_blocks,),
            in_specs=in_specs, out_specs=out_specs),
        compiler_params=pltpu.CompilerParams(dimension_semantics=("parallel",)),
    )(hc, fs_b, eps, *weights)

    # unpack the lane-dense slab; transpose back to torch (T, B, .) layout
    out = {}
    off = 0
    for name, width in (('queries', E), ('zs', Dz), ('sampled_latents', L),
                        ('pz_means', L), ('pz_stds', L), ('qz_means', L),
                        ('qz_stds', L), ('attn_fs_weights', M)):
        piece = slab[:, :, off:off + width]
        off += width
        if name == 'attn_fs_weights':
            out[name] = piece                      # (batch, seq_len, seq_len_fs)
        else:
            out[name] = jnp.transpose(piece, (1, 0, 2))
    return out


def reference_compute_zs(attn_hs, attn_cs, fs, eps_p, eps_q, p, *,
                         num_heads, pz_mult, qz_mult, pz_std_mult, qz_std_mult,
                         pz_min_std, qz_min_std):
    """Pure-JAX reference replicating the PyTorch compute_zs (eval mode)."""
    L = p['w_prior'].shape[0] // 2
    ein = functools.partial(jnp.einsum, precision=_PRECISION)
    mix = jnp.concatenate([attn_hs, attn_cs], axis=-1)
    q = jax.nn.relu(ein('tbi,oi->tbo', mix, p['w_q_net']) + p['b_q_net'][0])
    raw_p = ein('tbo,lo->tbl', q, p['w_prior']) + p['b_prior'][0]
    pz_mean, pz_std_raw = raw_p[..., :L], raw_p[..., L:]
    pz_std = jnp.maximum(jax.nn.softplus(pz_std_raw), pz_min_std)

    T, B, E = q.shape
    M = fs.shape[0]
    hd = E // num_heads
    qp = (ein('tbe,oe->tbo', q, p['w_q']) + p['b_q'][0]).reshape(T, B, num_heads, hd)
    kp = (ein('mbf,of->mbo', fs, p['w_k']) + p['b_k'][0]).reshape(M, B, num_heads, hd)
    vp = (ein('mbf,of->mbo', fs, p['w_v']) + p['b_v'][0]).reshape(M, B, num_heads, hd)
    sc = ein('tbhd,mbhd->bhtm', qp / math.sqrt(hd), kp)
    w = jax.nn.softmax(sc, axis=-1)
    attn = ein('bhtm,mbhd->tbhd', w, vp).reshape(T, B, E)
    attn_out = ein('tbe,oe->tbo', attn, p['w_o']) + p['b_o'][0]
    attn_w = w.mean(axis=1)

    raw_q = ein('tbe,le->tbl', jax.nn.relu(attn_out), p['w_post']) + p['b_post'][0]
    qz_mean, qz_std_raw = raw_q[..., :L], raw_q[..., L:]
    qz_std = jnp.maximum(jax.nn.softplus(qz_std_raw), qz_min_std)

    sampled = (pz_mult * (pz_mean + pz_std_mult * pz_std * eps_p)
               + qz_mult * (qz_mean + qz_std_mult * qz_std * eps_q))
    zs = jax.nn.relu(ein('tbl,zl->tbz', sampled, p['w_trans']) + p['b_trans'][0])
    return {'zs': zs, 'queries': q, 'sampled_latents': sampled,
            'pz_means': pz_mean, 'pz_stds': pz_std,
            'qz_means': qz_mean, 'qz_stds': qz_std, 'attn_fs_weights': attn_w}


def init_params(key, *, dim_attn_h, dim_c, dim_f, dim_query, dim_latent, dim_z):
    shapes = {
        'w_q_net': (dim_query, dim_attn_h + dim_c), 'b_q_net': (1, dim_query),
        'w_q': (dim_query, dim_query), 'b_q': (1, dim_query),
        'w_k': (dim_query, dim_f),     'b_k': (1, dim_query),
        'w_v': (dim_query, dim_f),     'b_v': (1, dim_query),
        'w_o': (dim_query, dim_query), 'b_o': (1, dim_query),
        'w_prior': (2 * dim_latent, dim_query), 'b_prior': (1, 2 * dim_latent),
        'w_post':  (2 * dim_latent, dim_query), 'b_post':  (1, 2 * dim_latent),
        'w_trans': (dim_z, dim_latent),         'b_trans': (1, dim_z),
    }
    params = {}
    for i, (name, shp) in enumerate(sorted(shapes.items())):
        params[name] = 0.1 * jax.random.normal(jax.random.fold_in(key, i), shp, jnp.float32)
    return params


if __name__ == "__main__":
    T, M = 8, 16                      # seq_len, seq_len_fs
    dim_attn_h, dim_c, dim_f = 32, 32, 64
    dim_query, dim_latent, dim_z = 128, 16, 32
    num_heads = 4

    key = jax.random.PRNGKey(0)
    k_par, k_data = jax.random.split(key)
    params = init_params(k_par, dim_attn_h=dim_attn_h, dim_c=dim_c, dim_f=dim_f,
                         dim_query=dim_query, dim_latent=dim_latent, dim_z=dim_z)

    names = ('zs', 'queries', 'sampled_latents', 'pz_means', 'pz_stds',
             'qz_means', 'qz_stds', 'attn_fs_weights')

    cases = [
        # (batch, num_batch_blocks, hyper-params)
        (2, None, dict(num_heads=num_heads, pz_mult=0.0, qz_mult=1.0,
                       pz_std_mult=1.0, qz_std_mult=1.0,
                       pz_min_std=0.0, qz_min_std=0.0)),
        (4, 2,    dict(num_heads=num_heads, pz_mult=0.5, qz_mult=1.0,
                       pz_std_mult=0.7, qz_std_mult=1.3,
                       pz_min_std=0.05, qz_min_std=0.02)),
    ]

    for case, (B, nblk, hp) in enumerate(cases):
        kk = jax.random.fold_in(k_data, case)
        k_hs, k_cs, k_fs, k_ep, k_eq = jax.random.split(kk, 5)
        attn_hs = jax.random.normal(k_hs, (T, B, dim_attn_h), jnp.float32)
        attn_cs = jax.random.normal(k_cs, (T, B, dim_c), jnp.float32)
        fs = jax.random.normal(k_fs, (M, B, dim_f), jnp.float32)
        eps_p = jax.random.normal(k_ep, (T, B, dim_latent), jnp.float32)
        eps_q = jax.random.normal(k_eq, (T, B, dim_latent), jnp.float32)

        out = vrnn_compute_zs(attn_hs, attn_cs, fs, eps_p, eps_q, params,
                              num_batch_blocks=nblk, **hp)
        out = jax.tree_util.tree_map(jax.block_until_ready, out)
        ref = reference_compute_zs(attn_hs, attn_cs, fs, eps_p, eps_q, params, **hp)

        for name in names:
            assert out[name].shape == ref[name].shape, (case, name)
            assert jnp.allclose(out[name], ref[name], rtol=2e-3, atol=2e-3), (case, name)

    print("KERNEL_OK")
</pallas_src>

<mosaic_0001>
module attributes {stable_mosaic.version = 11 : i64} {
  func.func @vrnn_compute_zs_kernel(%arg0: i32, %arg1: memref<1x8x64xf32, #tpu.memory_space<vmem>>, %arg2: memref<1x16x64xf32, #tpu.memory_space<vmem>>, %arg3: memref<1x8x32xf32, #tpu.memory_space<vmem>>, %arg4: memref<64x128xf32, #tpu.memory_space<vmem>>, %arg5: memref<1x128xf32, #tpu.memory_space<vmem>>, %arg6: memref<128x160xf32, #tpu.memory_space<vmem>>, %arg7: memref<1x160xf32, #tpu.memory_space<vmem>>, %arg8: memref<64x256xf32, #tpu.memory_space<vmem>>, %arg9: memref<1x256xf32, #tpu.memory_space<vmem>>, %arg10: memref<128x128xf32, #tpu.memory_space<vmem>>, %arg11: memref<1x128xf32, #tpu.memory_space<vmem>>, %arg12: memref<128x32xf32, #tpu.memory_space<vmem>>, %arg13: memref<1x32xf32, #tpu.memory_space<vmem>>, %arg14: memref<16x32xf32, #tpu.memory_space<vmem>>, %arg15: memref<1x32xf32, #tpu.memory_space<vmem>>, %arg16: memref<1x8x256xf32, #tpu.memory_space<vmem>>) attributes {dimension_semantics = [#tpu.dimension_semantics<parallel>], iteration_bounds = array<i64: 2>, scalar_prefetch = 0 : i64, scratch_operands = 0 : i64, tpu.core_type = #tpu.core_type<tc>, window_params = [{transform_indices = @transform_0, window_bounds = array<i64: 1, 8, 64>}, {transform_indices = @transform_1, window_bounds = array<i64: 1, 16, 64>}, {transform_indices = @transform_2, window_bounds = array<i64: 1, 8, 32>}, {pipeline_mode = #tpu.pipeline_mode<synchronous>, transform_indices = @transform_3, window_bounds = array<i64: 64, 128>}, {pipeline_mode = #tpu.pipeline_mode<synchronous>, transform_indices = @transform_4, window_bounds = array<i64: 1, 128>}, {pipeline_mode = #tpu.pipeline_mode<synchronous>, transform_indices = @transform_5, window_bounds = array<i64: 128, 160>}, {pipeline_mode = #tpu.pipeline_mode<synchronous>, transform_indices = @transform_6, window_bounds = array<i64: 1, 160>}, {pipeline_mode = #tpu.pipeline_mode<synchronous>, transform_indices = @transform_7, window_bounds = array<i64: 64, 256>}, {pipeline_mode = #tpu.pipeline_mode<synchronous>, transform_indices = @transform_8, window_bounds = array<i64: 1, 256>}, {pipeline_mode = #tpu.pipeline_mode<synchronous>, transform_indices = @transform_9, window_bounds = array<i64: 128, 128>}, {pipeline_mode = #tpu.pipeline_mode<synchronous>, transform_indices = @transform_10, window_bounds = array<i64: 1, 128>}, {pipeline_mode = #tpu.pipeline_mode<synchronous>, transform_indices = @transform_11, window_bounds = array<i64: 128, 32>}, {pipeline_mode = #tpu.pipeline_mode<synchronous>, transform_indices = @transform_12, window_bounds = array<i64: 1, 32>}, {pipeline_mode = #tpu.pipeline_mode<synchronous>, transform_indices = @transform_13, window_bounds = array<i64: 16, 32>}, {pipeline_mode = #tpu.pipeline_mode<synchronous>, transform_indices = @transform_14, window_bounds = array<i64: 1, 32>}, {transform_indices = @transform_15, window_bounds = array<i64: 1, 8, 256>}]} {
    %c0 = arith.constant 0 : index
    %c0_0 = arith.constant 0 : index
    %c0_1 = arith.constant 0 : index
    %0 = vector.load %arg1[%c0, %c0_0, %c0_1] : memref<1x8x64xf32, #tpu.memory_space<vmem>>, vector<1x8x64xf32>
    %1 = vector.shape_cast %0 : vector<1x8x64xf32> to vector<8x64xf32>
    %c0_2 = arith.constant 0 : index
    %c0_3 = arith.constant 0 : index
    %2 = vector.load %arg4[%c0_2, %c0_3] : memref<64x128xf32, #tpu.memory_space<vmem>>, vector<64x128xf32>
    %cst = arith.constant dense<0.000000e+00> : vector<8x128xf32>
    %3 = tpu.matmul %1, %2, %cst {dimension_numbers = #tpu.dot_dimension_numbers<[1], [0], [0], [1], [0, 0, 1, 1], [], []>} : vector<8x64xf32>, vector<64x128xf32>, vector<8x128xf32> -> vector<8x128xf32>
    %c0_4 = arith.constant 0 : index
    %c0_5 = arith.constant 0 : index
    %4 = vector.load %arg5[%c0_4, %c0_5] : memref<1x128xf32, #tpu.memory_space<vmem>>, vector<1x128xf32>
    %5 = vector.broadcast %4 : vector<1x128xf32> to vector<8x128xf32>
    %6 = arith.addf %3, %5 : vector<8x128xf32>
    %cst_6 = arith.constant 0.000000e+00 : f32
    %7 = vector.broadcast %cst_6 : f32 to vector<8x128xf32>
    %8 = arith.maximumf %6, %7 : vector<8x128xf32>
    %c0_7 = arith.constant 0 : index
    %c0_8 = arith.constant 0 : index
    %9 = vector.load %arg6[%c0_7, %c0_8] : memref<128x160xf32, #tpu.memory_space<vmem>>, vector<128x160xf32>
    %cst_9 = arith.constant dense<0.000000e+00> : vector<8x160xf32>
    %10 = tpu.matmul %8, %9, %cst_9 {dimension_numbers = #tpu.dot_dimension_numbers<[1], [0], [0], [1], [0, 0, 1, 1], [], []>} : vector<8x128xf32>, vector<128x160xf32>, vector<8x160xf32> -> vector<8x160xf32>
    %c0_10 = arith.constant 0 : index
    %c0_11 = arith.constant 0 : index
    %11 = vector.load %arg7[%c0_10, %c0_11] : memref<1x160xf32, #tpu.memory_space<vmem>>, vector<1x160xf32>
    %12 = vector.broadcast %11 : vector<1x160xf32> to vector<8x160xf32>
    %13 = arith.addf %10, %12 : vector<8x160xf32>
    %14 = vector.extract_strided_slice %13 {offsets = [0, 0], sizes = [8, 128], strides = [1, 1]} : vector<8x160xf32> to vector<8x128xf32>
    %15 = vector.extract_strided_slice %13 {offsets = [0, 128], sizes = [8, 16], strides = [1, 1]} : vector<8x160xf32> to vector<8x16xf32>
    %16 = vector.extract_strided_slice %13 {offsets = [0, 144], sizes = [8, 16], strides = [1, 1]} : vector<8x160xf32> to vector<8x16xf32>
    %cst_12 = arith.constant 2.000000e+01 : f32
    %17 = vector.broadcast %cst_12 : f32 to vector<8x16xf32>
    %18 = arith.cmpf ogt, %16, %17 : vector<8x16xf32>
    %cst_13 = arith.constant 2.000000e+01 : f32
    %19 = vector.broadcast %cst_13 : f32 to vector<8x16xf32>
    %20 = arith.minimumf %16, %19 : vector<8x16xf32>
    %21 = math.exp %20 : vector<8x16xf32>
    %22 = math.log1p %21 : vector<8x16xf32>
    %23 = arith.select %18, %16, %22 : vector<8x16xi1>, vector<8x16xf32>
    %cst_14 = arith.constant 0.000000e+00 : f32
    %24 = vector.broadcast %cst_14 : f32 to vector<8x16xf32>
    %25 = arith.maximumf %23, %24 : vector<8x16xf32>
    %c0_15 = arith.constant 0 : index
    %c0_16 = arith.constant 0 : index
    %c0_17 = arith.constant 0 : index
    %26 = vector.load %arg2[%c0_15, %c0_16, %c0_17] : memref<1x16x64xf32, #tpu.memory_space<vmem>>, vector<1x16x64xf32>
    %27 = vector.shape_cast %26 : vector<1x16x64xf32> to vector<16x64xf32>
    %c0_18 = arith.constant 0 : index
    %c0_19 = arith.constant 0 : index
    %28 = vector.load %arg8[%c0_18, %c0_19] : memref<64x256xf32, #tpu.memory_space<vmem>>, vector<64x256xf32>
    %cst_20 = arith.constant dense<0.000000e+00> : vector<16x256xf32>
    %29 = tpu.matmul %27, %28, %cst_20 {dimension_numbers = #tpu.dot_dimension_numbers<[1], [0], [0], [1], [0, 0, 1, 1], [], []>} : vector<16x64xf32>, vector<64x256xf32>, vector<16x256xf32> -> vector<16x256xf32>
    %c0_21 = arith.constant 0 : index
    %c0_22 = arith.constant 0 : index
    %30 = vector.load %arg9[%c0_21, %c0_22] : memref<1x256xf32, #tpu.memory_space<vmem>>, vector<1x256xf32>
    %31 = vector.broadcast %30 : vector<1x256xf32> to vector<16x256xf32>
    %32 = arith.addf %29, %31 : vector<16x256xf32>
    %33 = vector.extract_strided_slice %32 {offsets = [0, 0], sizes = [16, 128], strides = [1, 1]} : vector<16x256xf32> to vector<16x128xf32>
    %34 = vector.shape_cast %33 : vector<16x128xf32> to vector<1x16x128xf32>
    %35 = vector.extract_strided_slice %32 {offsets = [0, 128], sizes = [16, 128], strides = [1, 1]} : vector<16x256xf32> to vector<16x128xf32>
    %36 = vector.shape_cast %35 : vector<16x128xf32> to vector<1x16x128xf32>
    %37 = vector.shape_cast %14 : vector<8x128xf32> to vector<1x8x128xf32>
    %cst_23 = arith.constant 0.000000e+00 : f32
    %38 = vector.broadcast %cst_23 : f32 to vector<1x8x16xf32>
    %39 = vector.extract_strided_slice %37 {offsets = [0, 0, 0], sizes = [1, 8, 32], strides = [1, 1, 1]} : vector<1x8x128xf32> to vector<1x8x32xf32>
    %cst_24 = arith.constant 0.176776692 : f32
    %40 = vector.broadcast %cst_24 : f32 to vector<1x8x32xf32>
    %41 = arith.mulf %39, %40 : vector<1x8x32xf32>
    %42 = vector.extract_strided_slice %34 {offsets = [0, 0, 0], sizes = [1, 16, 32], strides = [1, 1, 1]} : vector<1x16x128xf32> to vector<1x16x32xf32>
    %43 = vector.extract_strided_slice %36 {offsets = [0, 0, 0], sizes = [1, 16, 32], strides = [1, 1, 1]} : vector<1x16x128xf32> to vector<1x16x32xf32>
    "tpu.trace_start"() <{level = 10 : i32, message = "btd,bmd->btm"}> : () -> ()
    %cst_25 = arith.constant dense<0.000000e+00> : vector<1x8x16xf32>
    %44 = tpu.matmul %41, %42, %cst_25 {dimension_numbers = #tpu.dot_dimension_numbers<[2], [2], [1], [1], [0, 0, 0, 1, 1, 1], [0], [0]>} : vector<1x8x32xf32>, vector<1x16x32xf32>, vector<1x8x16xf32> -> vector<1x8x16xf32>
    "tpu.trace_stop"() : () -> ()
    %cst_26 = arith.constant dense<0xFF800000> : vector<1x8xf32>
    %45 = vector.multi_reduction <maximumf>, %44, %cst_26 [2] : vector<1x8x16xf32> to vector<1x8xf32>
    %46 = vector.shape_cast %45 : vector<1x8xf32> to vector<1x8x1xf32>
    %47 = vector.broadcast %46 : vector<1x8x1xf32> to vector<1x8x16xf32>
    %48 = arith.subf %44, %47 : vector<1x8x16xf32>
    %49 = math.exp %48 : vector<1x8x16xf32>
    %cst_27 = arith.constant dense<0.000000e+00> : vector<1x8xf32>
    %50 = vector.multi_reduction <add>, %49, %cst_27 [2] : vector<1x8x16xf32> to vector<1x8xf32>
    %51 = vector.shape_cast %50 : vector<1x8xf32> to vector<1x8x1xf32>
    %52 = tpu.reciprocal %51 {approx = true} : vector<1x8x1xf32> -> vector<1x8x1xf32>
    %53 = vector.broadcast %52 : vector<1x8x1xf32> to vector<1x8x16xf32>
    %54 = arith.mulf %49, %53 : vector<1x8x16xf32>
    %55 = arith.addf %38, %54 : vector<1x8x16xf32>
    "tpu.trace_start"() <{level = 10 : i32, message = "btm,bmd->btd"}> : () -> ()
    %cst_28 = arith.constant dense<0.000000e+00> : vector<1x8x32xf32>
    %56 = tpu.matmul %54, %43, %cst_28 {dimension_numbers = #tpu.dot_dimension_numbers<[2], [1], [1], [2], [0, 0, 0, 1, 1, 2], [0], [0]>} : vector<1x8x16xf32>, vector<1x16x32xf32>, vector<1x8x32xf32> -> vector<1x8x32xf32>
    "tpu.trace_stop"() : () -> ()
    %57 = vector.extract_strided_slice %37 {offsets = [0, 0, 32], sizes = [1, 8, 32], strides = [1, 1, 1]} : vector<1x8x128xf32> to vector<1x8x32xf32>
    %cst_29 = arith.constant 0.176776692 : f32
    %58 = vector.broadcast %cst_29 : f32 to vector<1x8x32xf32>
    %59 = arith.mulf %57, %58 : vector<1x8x32xf32>
    %60 = vector.extract_strided_slice %34 {offsets = [0, 0, 32], sizes = [1, 16, 32], strides = [1, 1, 1]} : vector<1x16x128xf32> to vector<1x16x32xf32>
    %61 = vector.extract_strided_slice %36 {offsets = [0, 0, 32], sizes = [1, 16, 32], strides = [1, 1, 1]} : vector<1x16x128xf32> to vector<1x16x32xf32>
    "tpu.trace_start"() <{level = 10 : i32, message = "btd,bmd->btm"}> : () -> ()
    %cst_30 = arith.constant dense<0.000000e+00> : vector<1x8x16xf32>
    %62 = tpu.matmul %59, %60, %cst_30 {dimension_numbers = #tpu.dot_dimension_numbers<[2], [2], [1], [1], [0, 0, 0, 1, 1, 1], [0], [0]>} : vector<1x8x32xf32>, vector<1x16x32xf32>, vector<1x8x16xf32> -> vector<1x8x16xf32>
    "tpu.trace_stop"() : () -> ()
    %cst_31 = arith.constant dense<0xFF800000> : vector<1x8xf32>
    %63 = vector.multi_reduction <maximumf>, %62, %cst_31 [2] : vector<1x8x16xf32> to vector<1x8xf32>
    %64 = vector.shape_cast %63 : vector<1x8xf32> to vector<1x8x1xf32>
    %65 = vector.broadcast %64 : vector<1x8x1xf32> to vector<1x8x16xf32>
    %66 = arith.subf %62, %65 : vector<1x8x16xf32>
    %67 = math.exp %66 : vector<1x8x16xf32>
    %cst_32 = arith.constant dense<0.000000e+00> : vector<1x8xf32>
    %68 = vector.multi_reduction <add>, %67, %cst_32 [2] : vector<1x8x16xf32> to vector<1x8xf32>
    %69 = vector.shape_cast %68 : vector<1x8xf32> to vector<1x8x1xf32>
    %70 = tpu.reciprocal %69 {approx = true} : vector<1x8x1xf32> -> vector<1x8x1xf32>
    %71 = vector.broadcast %70 : vector<1x8x1xf32> to vector<1x8x16xf32>
    %72 = arith.mulf %67, %71 : vector<1x8x16xf32>
    %73 = arith.addf %55, %72 : vector<1x8x16xf32>
    "tpu.trace_start"() <{level = 10 : i32, message = "btm,bmd->btd"}> : () -> ()
    %cst_33 = arith.constant dense<0.000000e+00> : vector<1x8x32xf32>
    %74 = tpu.matmul %72, %61, %cst_33 {dimension_numbers = #tpu.dot_dimension_numbers<[2], [1], [1], [2], [0, 0, 0, 1, 1, 2], [0], [0]>} : vector<1x8x16xf32>, vector<1x16x32xf32>, vector<1x8x32xf32> -> vector<1x8x32xf32>
    "tpu.trace_stop"() : () -> ()
    %75 = vector.extract_strided_slice %37 {offsets = [0, 0, 64], sizes = [1, 8, 32], strides = [1, 1, 1]} : vector<1x8x128xf32> to vector<1x8x32xf32>
    %cst_34 = arith.constant 0.176776692 : f32
    %76 = vector.broadcast %cst_34 : f32 to vector<1x8x32xf32>
    %77 = arith.mulf %75, %76 : vector<1x8x32xf32>
    %78 = vector.extract_strided_slice %34 {offsets = [0, 0, 64], sizes = [1, 16, 32], strides = [1, 1, 1]} : vector<1x16x128xf32> to vector<1x16x32xf32>
    %79 = vector.extract_strided_slice %36 {offsets = [0, 0, 64], sizes = [1, 16, 32], strides = [1, 1, 1]} : vector<1x16x128xf32> to vector<1x16x32xf32>
    "tpu.trace_start"() <{level = 10 : i32, message = "btd,bmd->btm"}> : () -> ()
    %cst_35 = arith.constant dense<0.000000e+00> : vector<1x8x16xf32>
    %80 = tpu.matmul %77, %78, %cst_35 {dimension_numbers = #tpu.dot_dimension_numbers<[2], [2], [1], [1], [0, 0, 0, 1, 1, 1], [0], [0]>} : vector<1x8x32xf32>, vector<1x16x32xf32>, vector<1x8x16xf32> -> vector<1x8x16xf32>
    "tpu.trace_stop"() : () -> ()
    %cst_36 = arith.constant dense<0xFF800000> : vector<1x8xf32>
    %81 = vector.multi_reduction <maximumf>, %80, %cst_36 [2] : vector<1x8x16xf32> to vector<1x8xf32>
    %82 = vector.shape_cast %81 : vector<1x8xf32> to vector<1x8x1xf32>
    %83 = vector.broadcast %82 : vector<1x8x1xf32> to vector<1x8x16xf32>
    %84 = arith.subf %80, %83 : vector<1x8x16xf32>
    %85 = math.exp %84 : vector<1x8x16xf32>
    %cst_37 = arith.constant dense<0.000000e+00> : vector<1x8xf32>
    %86 = vector.multi_reduction <add>, %85, %cst_37 [2] : vector<1x8x16xf32> to vector<1x8xf32>
    %87 = vector.shape_cast %86 : vector<1x8xf32> to vector<1x8x1xf32>
    %88 = tpu.reciprocal %87 {approx = true} : vector<1x8x1xf32> -> vector<1x8x1xf32>
    %89 = vector.broadcast %88 : vector<1x8x1xf32> to vector<1x8x16xf32>
    %90 = arith.mulf %85, %89 : vector<1x8x16xf32>
    %91 = arith.addf %73, %90 : vector<1x8x16xf32>
    "tpu.trace_start"() <{level = 10 : i32, message = "btm,bmd->btd"}> : () -> ()
    %cst_38 = arith.constant dense<0.000000e+00> : vector<1x8x32xf32>
    %92 = tpu.matmul %90, %79, %cst_38 {dimension_numbers = #tpu.dot_dimension_numbers<[2], [1], [1], [2], [0, 0, 0, 1, 1, 2], [0], [0]>} : vector<1x8x16xf32>, vector<1x16x32xf32>, vector<1x8x32xf32> -> vector<1x8x32xf32>
    "tpu.trace_stop"() : () -> ()
    %93 = vector.extract_strided_slice %37 {offsets = [0, 0, 96], sizes = [1, 8, 32], strides = [1, 1, 1]} : vector<1x8x128xf32> to vector<1x8x32xf32>
    %cst_39 = arith.constant 0.176776692 : f32
    %94 = vector.broadcast %cst_39 : f32 to vector<1x8x32xf32>
    %95 = arith.mulf %93, %94 : vector<1x8x32xf32>
    %96 = vector.extract_strided_slice %34 {offsets = [0, 0, 96], sizes = [1, 16, 32], strides = [1, 1, 1]} : vector<1x16x128xf32> to vector<1x16x32xf32>
    %97 = vector.extract_strided_slice %36 {offsets = [0, 0, 96], sizes = [1, 16, 32], strides = [1, 1, 1]} : vector<1x16x128xf32> to vector<1x16x32xf32>
    "tpu.trace_start"() <{level = 10 : i32, message = "btd,bmd->btm"}> : () -> ()
    %cst_40 = arith.constant dense<0.000000e+00> : vector<1x8x16xf32>
    %98 = tpu.matmul %95, %96, %cst_40 {dimension_numbers = #tpu.dot_dimension_numbers<[2], [2], [1], [1], [0, 0, 0, 1, 1, 1], [0], [0]>} : vector<1x8x32xf32>, vector<1x16x32xf32>, vector<1x8x16xf32> -> vector<1x8x16xf32>
    "tpu.trace_stop"() : () -> ()
    %cst_41 = arith.constant dense<0xFF800000> : vector<1x8xf32>
    %99 = vector.multi_reduction <maximumf>, %98, %cst_41 [2] : vector<1x8x16xf32> to vector<1x8xf32>
    %100 = vector.shape_cast %99 : vector<1x8xf32> to vector<1x8x1xf32>
    %101 = vector.broadcast %100 : vector<1x8x1xf32> to vector<1x8x16xf32>
    %102 = arith.subf %98, %101 : vector<1x8x16xf32>
    %103 = math.exp %102 : vector<1x8x16xf32>
    %cst_42 = arith.constant dense<0.000000e+00> : vector<1x8xf32>
    %104 = vector.multi_reduction <add>, %103, %cst_42 [2] : vector<1x8x16xf32> to vector<1x8xf32>
    %105 = vector.shape_cast %104 : vector<1x8xf32> to vector<1x8x1xf32>
    %106 = tpu.reciprocal %105 {approx = true} : vector<1x8x1xf32> -> vector<1x8x1xf32>
    %107 = vector.broadcast %106 : vector<1x8x1xf32> to vector<1x8x16xf32>
    %108 = arith.mulf %103, %107 : vector<1x8x16xf32>
    %109 = arith.addf %91, %108 : vector<1x8x16xf32>
    "tpu.trace_start"() <{level = 10 : i32, message = "btm,bmd->btd"}> : () -> ()
    %cst_43 = arith.constant dense<0.000000e+00> : vector<1x8x32xf32>
    %110 = tpu.matmul %108, %97, %cst_43 {dimension_numbers = #tpu.dot_dimension_numbers<[2], [1], [1], [2], [0, 0, 0, 1, 1, 2], [0], [0]>} : vector<1x8x16xf32>, vector<1x16x32xf32>, vector<1x8x32xf32> -> vector<1x8x32xf32>
    "tpu.trace_stop"() : () -> ()
    %111 = tpu.concatenate %56, %74, %92, %110 in 2 : vector<1x8x32xf32>, vector<1x8x32xf32>, vector<1x8x32xf32>, vector<1x8x32xf32> -> vector<1x8x128xf32>
    %112 = vector.shape_cast %111 : vector<1x8x128xf32> to vector<8x128xf32>
    %c0_44 = arith.constant 0 : index
    %c0_45 = arith.constant 0 : index
    %113 = vector.load %arg10[%c0_44, %c0_45] : memref<128x128xf32, #tpu.memory_space<vmem>>, vector<128x128xf32>
    %cst_46 = arith.constant dense<0.000000e+00> : vector<8x128xf32>
    %114 = tpu.matmul %112, %113, %cst_46 {dimension_numbers = #tpu.dot_dimension_numbers<[1], [0], [0], [1], [0, 0, 1, 1], [], []>} : vector<8x128xf32>, vector<128x128xf32>, vector<8x128xf32> -> vector<8x128xf32>
    %c0_47 = arith.constant 0 : index
    %c0_48 = arith.constant 0 : index
    %115 = vector.load %arg11[%c0_47, %c0_48] : memref<1x128xf32, #tpu.memory_space<vmem>>, vector<1x128xf32>
    %116 = vector.broadcast %115 : vector<1x128xf32> to vector<8x128xf32>
    %117 = arith.addf %114, %116 : vector<8x128xf32>
    %cst_49 = arith.constant 2.500000e-01 : f32
    %118 = vector.broadcast %cst_49 : f32 to vector<1x8x16xf32>
    %119 = arith.mulf %109, %118 : vector<1x8x16xf32>
    %120 = vector.shape_cast %119 : vector<1x8x16xf32> to vector<8x16xf32>
    %cst_50 = arith.constant 0.000000e+00 : f32
    %121 = vector.broadcast %cst_50 : f32 to vector<8x128xf32>
    %122 = arith.maximumf %117, %121 : vector<8x128xf32>
    %c0_51 = arith.constant 0 : index
    %c0_52 = arith.constant 0 : index
    %123 = vector.load %arg12[%c0_51, %c0_52] : memref<128x32xf32, #tpu.memory_space<vmem>>, vector<128x32xf32>
    %cst_53 = arith.constant dense<0.000000e+00> : vector<8x32xf32>
    %124 = tpu.matmul %122, %123, %cst_53 {dimension_numbers = #tpu.dot_dimension_numbers<[1], [0], [0], [1], [0, 0, 1, 1], [], []>} : vector<8x128xf32>, vector<128x32xf32>, vector<8x32xf32> -> vector<8x32xf32>
    %c0_54 = arith.constant 0 : index
    %c0_55 = arith.constant 0 : index
    %125 = vector.load %arg13[%c0_54, %c0_55] : memref<1x32xf32, #tpu.memory_space<vmem>>, vector<1x32xf32>
    %126 = vector.broadcast %125 : vector<1x32xf32> to vector<8x32xf32>
    %127 = arith.addf %124, %126 : vector<8x32xf32>
    %128 = vector.extract_strided_slice %127 {offsets = [0, 0], sizes = [8, 16], strides = [1, 1]} : vector<8x32xf32> to vector<8x16xf32>
    %129 = vector.extract_strided_slice %127 {offsets = [0, 16], sizes = [8, 16], strides = [1, 1]} : vector<8x32xf32> to vector<8x16xf32>
    %cst_56 = arith.constant 2.000000e+01 : f32
    %130 = vector.broadcast %cst_56 : f32 to vector<8x16xf32>
    %131 = arith.cmpf ogt, %129, %130 : vector<8x16xf32>
    %cst_57 = arith.constant 2.000000e+01 : f32
    %132 = vector.broadcast %cst_57 : f32 to vector<8x16xf32>
    %133 = arith.minimumf %129, %132 : vector<8x16xf32>
    %134 = math.exp %133 : vector<8x16xf32>
    %135 = math.log1p %134 : vector<8x16xf32>
    %136 = arith.select %131, %129, %135 : vector<8x16xi1>, vector<8x16xf32>
    %cst_58 = arith.constant 0.000000e+00 : f32
    %137 = vector.broadcast %cst_58 : f32 to vector<8x16xf32>
    %138 = arith.maximumf %136, %137 : vector<8x16xf32>
    %c0_59 = arith.constant 0 : index
    %c0_60 = arith.constant 0 : index
    %c0_61 = arith.constant 0 : index
    %139 = vector.load %arg3[%c0_59, %c0_60, %c0_61] : memref<1x8x32xf32, #tpu.memory_space<vmem>>, vector<1x8x32xf32>
    %140 = vector.shape_cast %139 : vector<1x8x32xf32> to vector<8x32xf32>
    %cst_62 = arith.constant 1.000000e+00 : f32
    %141 = vector.broadcast %cst_62 : f32 to vector<8x16xf32>
    %142 = arith.mulf %141, %25 : vector<8x16xf32>
    %143 = vector.extract_strided_slice %140 {offsets = [0, 0], sizes = [8, 16], strides = [1, 1]} : vector<8x32xf32> to vector<8x16xf32>
    %144 = arith.mulf %142, %143 : vector<8x16xf32>
    %145 = arith.addf %15, %144 : vector<8x16xf32>
    %cst_63 = arith.constant 0.000000e+00 : f32
    %146 = vector.broadcast %cst_63 : f32 to vector<8x16xf32>
    %147 = arith.mulf %146, %145 : vector<8x16xf32>
    %cst_64 = arith.constant 1.000000e+00 : f32
    %148 = vector.broadcast %cst_64 : f32 to vector<8x16xf32>
    %149 = arith.mulf %148, %138 : vector<8x16xf32>
    %150 = vector.extract_strided_slice %140 {offsets = [0, 16], sizes = [8, 16], strides = [1, 1]} : vector<8x32xf32> to vector<8x16xf32>
    %151 = arith.mulf %149, %150 : vector<8x16xf32>
    %152 = arith.addf %128, %151 : vector<8x16xf32>
    %cst_65 = arith.constant 1.000000e+00 : f32
    %153 = vector.broadcast %cst_65 : f32 to vector<8x16xf32>
    %154 = arith.mulf %153, %152 : vector<8x16xf32>
    %155 = arith.addf %147, %154 : vector<8x16xf32>
    %c0_66 = arith.constant 0 : index
    %c0_67 = arith.constant 0 : index
    %156 = vector.load %arg14[%c0_66, %c0_67] : memref<16x32xf32, #tpu.memory_space<vmem>>, vector<16x32xf32>
    %cst_68 = arith.constant dense<0.000000e+00> : vector<8x32xf32>
    %157 = tpu.matmul %155, %156, %cst_68 {dimension_numbers = #tpu.dot_dimension_numbers<[1], [0], [0], [1], [0, 0, 1, 1], [], []>} : vector<8x16xf32>, vector<16x32xf32>, vector<8x32xf32> -> vector<8x32xf32>
    %c0_69 = arith.constant 0 : index
    %c0_70 = arith.constant 0 : index
    %158 = vector.load %arg15[%c0_69, %c0_70] : memref<1x32xf32, #tpu.memory_space<vmem>>, vector<1x32xf32>
    %159 = vector.broadcast %158 : vector<1x32xf32> to vector<8x32xf32>
    %160 = arith.addf %157, %159 : vector<8x32xf32>
    %cst_71 = arith.constant 0.000000e+00 : f32
    %161 = vector.broadcast %cst_71 : f32 to vector<8x32xf32>
    %162 = arith.maximumf %160, %161 : vector<8x32xf32>
    %163 = tpu.concatenate %8, %162, %155, %15, %25, %128, %138, %120 in 1 : vector<8x128xf32>, vector<8x32xf32>, vector<8x16xf32>, vector<8x16xf32>, vector<8x16xf32>, vector<8x16xf32>, vector<8x16xf32>, vector<8x16xf32> -> vector<8x256xf32>
    %164 = vector.shape_cast %163 : vector<8x256xf32> to vector<1x8x256xf32>
    %c0_72 = arith.constant 0 : index
    %c0_73 = arith.constant 0 : index
    %c0_74 = arith.constant 0 : index
    %165 = vector.load %arg16[%c0_72, %c0_73, %c0_74] : memref<1x8x256xf32, #tpu.memory_space<vmem>>, vector<1x8x256xf32>
    tpu.vector_store %arg16[%c0_72, %c0_73, %c0_74], %164 {strides = array<i32>} : memref<1x8x256xf32, #tpu.memory_space<vmem>>, vector<1x8x256xf32>,
    return
  }
  func.func @transform_0(%arg0: i32) -> (i32, i32, i32) {
    %c0_i32 = arith.constant 0 : i32
    %c0_i32_0 = arith.constant 0 : i32
    %c0_i32_1 = arith.constant 0 : i32
    return %arg0, %c0_i32, %c0_i32_0 : i32, i32, i32
  }
  func.func @transform_1(%arg0: i32) -> (i32, i32, i32) {
    %c0_i32 = arith.constant 0 : i32
    %c0_i32_0 = arith.constant 0 : i32
    %c0_i32_1 = arith.constant 0 : i32
    return %arg0, %c0_i32, %c0_i32_0 : i32, i32, i32
  }
  func.func @transform_2(%arg0: i32) -> (i32, i32, i32) {
    %c0_i32 = arith.constant 0 : i32
    %c0_i32_0 = arith.constant 0 : i32
    %c0_i32_1 = arith.constant 0 : i32
    return %arg0, %c0_i32, %c0_i32_0 : i32, i32, i32
  }
  func.func @transform_3(%arg0: i32) -> (i32, i32) {
    %c0_i32 = arith.constant 0 : i32
    %c0_i32_0 = arith.constant 0 : i32
    %c0_i32_1 = arith.constant 0 : i32
    return %c0_i32, %c0_i32_0 : i32, i32
  }
  func.func @transform_4(%arg0: i32) -> (i32, i32) {
    %c0_i32 = arith.constant 0 : i32
    %c0_i32_0 = arith.constant 0 : i32
    %c0_i32_1 = arith.constant 0 : i32
    return %c0_i32, %c0_i32_0 : i32, i32
  }
  func.func @transform_5(%arg0: i32) -> (i32, i32) {
    %c0_i32 = arith.constant 0 : i32
    %c0_i32_0 = arith.constant 0 : i32
    %c0_i32_1 = arith.constant 0 : i32
    return %c0_i32, %c0_i32_0 : i32, i32
  }
  func.func @transform_6(%arg0: i32) -> (i32, i32) {
    %c0_i32 = arith.constant 0 : i32
    %c0_i32_0 = arith.constant 0 : i32
    %c0_i32_1 = arith.constant 0 : i32
    return %c0_i32, %c0_i32_0 : i32, i32
  }
  func.func @transform_7(%arg0: i32) -> (i32, i32) {
    %c0_i32 = arith.constant 0 : i32
    %c0_i32_0 = arith.constant 0 : i32
    %c0_i32_1 = arith.constant 0 : i32
    return %c0_i32, %c0_i32_0 : i32, i32
  }
  func.func @transform_8(%arg0: i32) -> (i32, i32) {
    %c0_i32 = arith.constant 0 : i32
    %c0_i32_0 = arith.constant 0 : i32
    %c0_i32_1 = arith.constant 0 : i32
    return %c0_i32, %c0_i32_0 : i32, i32
  }
  func.func @transform_9(%arg0: i32) -> (i32, i32) {
    %c0_i32 = arith.constant 0 : i32
    %c0_i32_0 = arith.constant 0 : i32
    %c0_i32_1 = arith.constant 0 : i32
    return %c0_i32, %c0_i32_0 : i32, i32
  }
  func.func @transform_10(%arg0: i32) -> (i32, i32) {
    %c0_i32 = arith.constant 0 : i32
    %c0_i32_0 = arith.constant 0 : i32
    %c0_i32_1 = arith.constant 0 : i32
    return %c0_i32, %c0_i32_0 : i32, i32
  }
  func.func @transform_11(%arg0: i32) -> (i32, i32) {
    %c0_i32 = arith.constant 0 : i32
    %c0_i32_0 = arith.constant 0 : i32
    %c0_i32_1 = arith.constant 0 : i32
    return %c0_i32, %c0_i32_0 : i32, i32
  }
  func.func @transform_12(%arg0: i32) -> (i32, i32) {
    %c0_i32 = arith.constant 0 : i32
    %c0_i32_0 = arith.constant 0 : i32
    %c0_i32_1 = arith.constant 0 : i32
    return %c0_i32, %c0_i32_0 : i32, i32
  }
  func.func @transform_13(%arg0: i32) -> (i32, i32) {
    %c0_i32 = arith.constant 0 : i32
    %c0_i32_0 = arith.constant 0 : i32
    %c0_i32_1 = arith.constant 0 : i32
    return %c0_i32, %c0_i32_0 : i32, i32
  }
  func.func @transform_14(%arg0: i32) -> (i32, i32) {
    %c0_i32 = arith.constant 0 : i32
    %c0_i32_0 = arith.constant 0 : i32
    %c0_i32_1 = arith.constant 0 : i32
    return %c0_i32, %c0_i32_0 : i32, i32
  }
  func.func @transform_15(%arg0: i32) -> (i32, i32, i32) {
    %c0_i32 = arith.constant 0 : i32
    %c0_i32_0 = arith.constant 0 : i32
    %c0_i32_1 = arith.constant 0 : i32
    return %arg0, %c0_i32, %c0_i32_0 : i32, i32, i32
  }
}

</mosaic_0001>

<bundles_post_ra>
// kernel: tpu_custom_call.1
= control target key start
LH: loop header
LB: loop body
LE: loop exit
PB: predicated region body
PF: predicated region fallthrough
CT: control target
= control target key end

     0   :  { %s2080_s0 = inlined_call_operand.vmem [shape: f32[2,8,64], index: 0, kind: input, shape index: {}]   ;;  %s2081_s1 = inlined_call_operand.vmem [shape: f32[2,16,64], index: 1, kind: input, shape index: {}]   ;;  %s2082_s2 = inlined_call_operand.vmem [shape: f32[2,8,32], index: 2, kind: input, shape index: {}]   ;;  %s2083_s3 = inlined_call_operand.vmem [shape: f32[64,128], index: 3, kind: input, shape index: {}]   ;;  %s2084_s4 = inlined_call_operand.vmem [shape: f32[1,128], index: 4, kind: input, shape index: {}]   ;;  %s2085_s5 = inlined_call_operand.vmem [shape: f32[128,160], index: 5, kind: input, shape index: {}]   ;;  %s2086_s6 = inlined_call_operand.vmem [shape: f32[1,160], index: 6, kind: input, shape index: {}]   ;;  %s2087_s7 = inlined_call_operand.vmem [shape: f32[64,256], index: 7, kind: input, shape index: {}]   ;;  %s2088_s8 = inlined_call_operand.vmem [shape: f32[1,256], index: 8, kind: input, shape index: {}]   ;;  %s2089_s9 = inlined_call_operand.vmem [shape: f32[128,128], index: 9, kind: input, shape index: {}]   ;;  %s2090_s10 = inlined_call_operand.vmem [shape: f32[1,128], index: 10, kind: input, shape index: {}]   ;;  %s2091_s11 = inlined_call_operand.vmem [shape: f32[128,32], index: 11, kind: input, shape index: {}]   ;;  %s2092_s12 = inlined_call_operand.vmem [shape: f32[1,32], index: 12, kind: input, shape index: {}]   ;;  %s2093_s13 = inlined_call_operand.vmem [shape: f32[16,32], index: 13, kind: input, shape index: {}]   ;;  %s2094_s14 = inlined_call_operand.vmem [shape: f32[1,32], index: 14, kind: input, shape index: {}]   ;;  %s2095_s15 = inlined_call_operand.hbm [shape: f32[2,8,256], index: 15, kind: output, shape index: {}]  }
   0x1   :  { %2107 = sst [smem:[#allocation12_spill]] %s2080_s0 }
   0x2   :  { %20 = vsyncpa [#allocation3], 0 }
   0x3   :  { %22 = vsyncpa [#allocation3 + $0x1], 0  ;;  %s1596_s18 = smov 0   ;;  %s1598_s19 = smov 0  }
   0x4   :  { %s1600_s20 = smov 0   ;;  %s1602_s21 = smov 0  }
   0x5 LB: > { %2108 = sst [smem:[#allocation5_spill]] %s1495_s18  ;;  %s1617_s22 = sadd.s32 4294967295, %s1507_s21   ;;  %s1507_s21 = sphi %s1602_s21, %s2125_s21   ;;  %s1503_s20 = sphi %s1600_s20, %s2127_s20   ;;  %s1499_s19 = sphi %s1598_s19, %s2129_s19   ;;  %s1495_s18 = sphi %s1596_s18, %s2128_s18  }
   0x6   : > { %2109 = sst [smem:[#allocation6_spill]] %s1503_s20  ;;  %s1318_s23 = sadd.s32 4294967294, %s1507_s21  }
   0x7   : > { %2110 = sst [smem:[#allocation7_spill]] %s1507_s21  ;;  %s1621_s24 = sadd.s32 1, %s1507_s21  }
   0x8   : > { %2111 = sst [smem:[#allocation8_spill]] %s1621_s24  ;;  %s365_s25 = sadd.s32 1, %s1503_s20 }
   0x9   : > { %s362_s26 = ssub.s32 %s1507_s21, %s1621_s24  ;;  %p375_p0 = scmp.ne.s32.totalorder %s1503_s20, %s1499_s19 }
   0xa   : > { %p363_p1 = scmp.eq.s32.totalorder %s362_s26, 0  ;;  %p376_p2 = scmp.eq.s32.totalorder %s1617_s22, 1 }
   0xb   : > { %p381_p3 = scmp.ne.s32.totalorder %s1499_s19, %s1495_s18  ;;  %p382_p4 = scmp.eq.s32.totalorder %s1318_s23, 1 }
   0xc   : > { %s1632_s27 = scalar_select %p363_p1, %s1503_s20, %s365_s25  }
   0xd   : > { %p1634_p5 = por %p376_p2, %p375_p0  ;;  %p1638_p6 = por %p382_p4, %p381_p3 }
   0xe   : > { %2112 = sst [smem:[#allocation9_spill]] %s1632_s27  ;;  %p1321_p7 = scmp.ge.s32.totalorder %s1507_s21, 1 }
   0xf   : > { %s2113_s28 = scalar_select %p1634_p5, 1, 0 }
  0x10   : > { %s2115_s29 = scalar_select %p1638_p6, 1, 0 }
  0x11   : > { %2114 = sst [smem:[#allocation10_spill]] %s2113_s28  ;;  %p458_p8 = scmp.lt.s32.totalorder %s1507_s21, 3 }
  0x12   : > { %2116 = sst [smem:[#allocation11_spill]] %s2115_s29 }
  0x13   : > { %p459_p9 = pnand %p1321_p7, %p458_p8 }
  0x14   : > { %p514_p10 = scmp.lt.s32.totalorder (!%p459_p9), %s1617_s22, 1  ;;  %s2117_s0 = sld [smem:[#allocation12_spill]] (!%p459_p9) }
  0x15   : > { %462 = sbr.rel (%p459_p9) target bundleno = 1910 (0x776), region = 80  ;;  %s2105_s16 = sand.u32 (!%p459_p9), 1, %s1499_s19  }
  0x16   : > { %s1322_s18 = sshll.u32 (!%p459_p9), %s2105_s16, 4  ;;  %s2106_s24 = smov (!%p459_p9), 32  }
  0x17   : > { %s1511_s30 = smov (!%p459_p9), 64   ;;  %s1515_s25 = smov (!%p459_p9), 80  }
  0x1a   : > { %v535_v0 = vld [vmem:[%s2083_s3 + $0x38] sm:$0xff]  ;;  %v534_v1 = vld [vmem:[%s2083_s3 + $0x30] sm:$0xff]  ;;  %v533_v2 = vld [vmem:[%s2083_s3 + $0x28] sm:$0xff]  ;;  %s1655_s27 = scalar_select %p514_p10, %s1617_s22, 1  ;;  %vm540_vm0 = vcmask 523264   ;;  %vm735_vm1 = vcmask 261120  }
  0x1b   : > { %552 = vmatpush.msra.mxu3 %v535_v0  ;;  %v532_v3 = vld [vmem:[%s2083_s3 + $0x20] sm:$0xff]  ;;  %v595_v4 = vld [vmem:[%s2085_s5 + $0xf0] sm:$0xff]  ;;  %v596_v5 = vld [vmem:[%s2085_s5 + $0xf8] sm:$0xff]  ;;  %vm765_vm2 = vcmask 130048   ;;  %vm1036_vm5 = vcmask 785408   ;;  %vm1208_vm8 = vcmask 392192  }
  0x1c   : > { %v531_v6 = vld [vmem:[%s2083_s3 + $0x18] sm:$0xff]  ;;  %v530_v7 = vld [vmem:[%s2083_s3 + $0x10] sm:$0xff]  ;;  %s2104_s20 = sshll.u32 %s1655_s27, 3  ;;  %603 = vmatpush.msra.mxu1 %v595_v4  ;;  %623 = vmatpush.msra.mxu2 %v596_v5  ;;  %v593_v8 = vld [vmem:[%s2085_s5 + $0xe0] sm:$0xff]  ;;  %s2118_s17 = sshll.u32 %s1655_s27, 3  ;;  %vm1211_vm9 = vcmask 654336  }
  0x1d   : > { %553 = vmatpush.msra.mxu3 %v534_v1  ;;  %v594_v9 = vld [vmem:[%s2085_s5 + $0xe8] sm:$0xff]  ;;  %v591_v10 = vld [vmem:[%s2085_s5 + $0xd0] sm:$0xff]  ;;  %v592_v11 = vld [vmem:[%s2085_s5 + $0xd8] sm:$0xff]  ;;  %s517_s21 = scalar_lea.vmem %s2117_s0, %s2104_s20  ;;  %s526_s29 = scalar_lea.vmem %s2082_s2, %s2118_s17  ;;  %vm1214_vm10 = vcmask 916480  }
  0x1e   : > { %604 = vmatpush.msra.mxu1 %v593_v8  ;;  %v529_v12 = vld [vmem:[%s2083_s3 + $0x8] sm:$0xff]  ;;  %624 = vmatpush.msra.mxu2 %v594_v9  ;;  %v589_v13 = vld [vmem:[%s2085_s5 + $0xc0] sm:$0xff]  ;;  %v587_v16 = vld [vmem:[%s2085_s5 + $0xb0] sm:$0xff]  ;;  %s1512_s20 = smov 16  }
  0x1f   : > { %554 = vmatpush.msra.mxu3 %v533_v2  ;;  %v590_v14 = vld [vmem:[%s2085_s5 + $0xc8] sm:$0xff]  ;;  %v528_v15 = vld [vmem:[%s2083_s3] sm:$0xff]  ;;  %v588_v18 = vld [vmem:[%s2085_s5 + $0xb8] sm:$0xff] }
  0x20   : > { %605 = vmatpush.msra.mxu1 %v591_v10  ;;  %625 = vmatpush.msra.mxu2 %v592_v11  ;;  %v527_v17 = vld [vmem:[%s517_s21] sm:$0xff]  ;;  %v674_v19 = vld [vmem:[%s2087_s7 + $0x70] sm:$0xff]  ;;  %v586_v21 = vld [vmem:[%s2085_s5 + $0xa8] sm:$0xff]  ;;  %s1354_s21 = sshll.u32 %s1655_s27, 4 }
  0x21   : > { %555 = vmatpush.msra.mxu3 %v532_v3  ;;  %v585_v20 = vld [vmem:[%s2085_s5 + $0xa0] sm:$0xff]  ;;  %v583_v23 = vld [vmem:[%s2085_s5 + $0x90] sm:$0xff]  ;;  %v584_v24 = vld [vmem:[%s2085_s5 + $0x98] sm:$0xff]  ;;  %s522_s28 = scalar_lea.vmem %s2081_s1, %s1354_s21  ;;  %s1509_s21 = smov 96  }
  0x22   : > { %606 = vmatpush.msra.mxu1 %v589_v13  ;;  %626 = vmatpush.msra.mxu2 %v590_v14  ;;  %v672_v22 = vld [vmem:[%s2087_s7 + $0x60] sm:$0xff]  ;;  %v670_v25 = vld [vmem:[%s2087_s7 + $0x50] sm:$0xff]  ;;  %v582_v27 = vld [vmem:[%s2085_s5 + $0x88] sm:$0xff] }
  0x23   : > { %556 = vmatpush.msra.mxu3 %v531_v6  ;;  %v581_v26 = vld [vmem:[%s2085_s5 + $0x80] sm:$0xff]  ;;  %v579_v29 = vld [vmem:[%s2085_s5 + $0x70] sm:$0xff]  ;;  %v580_v30 = vld [vmem:[%s2085_s5 + $0x78] sm:$0xff] }
  0x24   : > { %607 = vmatpush.msra.mxu1 %v587_v16  ;;  %627 = vmatpush.msra.mxu2 %v588_v18  ;;  %v668_v28 = vld [vmem:[%s2087_s7 + $0x40] sm:$0xff]  ;;  %v666_v31 = vld [vmem:[%s2087_s7 + $0x30] sm:$0xff]  ;;  %v578_v33 = vld [vmem:[%s2085_s5 + $0x68] sm:$0xff] }
  0x25   : > { %557 = vmatpush.msra.mxu3 %v530_v7  ;;  %v577_v32 = vld [vmem:[%s2085_s5 + $0x60] sm:$0xff]  ;;  %v575_v35 = vld [vmem:[%s2085_s5 + $0x50] sm:$0xff]  ;;  %v576_v36 = vld [vmem:[%s2085_s5 + $0x58] sm:$0xff] }
  0x26   : > { %608 = vmatpush.msra.mxu1 %v585_v20  ;;  %628 = vmatpush.msra.mxu2 %v586_v21  ;;  %v664_v34 = vld [vmem:[%s2087_s7 + $0x20] sm:$0xff]  ;;  %v662_v37 = vld [vmem:[%s2087_s7 + $0x10] sm:$0xff]  ;;  %v574_v39 = vld [vmem:[%s2085_s5 + $0x48] sm:$0xff] }
  0x27   : > { %558 = vmatpush.msra.mxu3 %v529_v12  ;;  %v573_v38 = vld [vmem:[%s2085_s5 + $0x40] sm:$0xff]  ;;  %v571_v41 = vld [vmem:[%s2085_s5 + $0x30] sm:$0xff]  ;;  %v572_v43 = vld [vmem:[%s2085_s5 + $0x38] sm:$0xff] }
  0x28   : > { %609 = vmatpush.msra.mxu1 %v583_v23  ;;  %629 = vmatpush.msra.mxu2 %v584_v24  ;;  %v660_v40 = vld [vmem:[%s2087_s7] sm:$0xff]  ;;  %v659_v44 = vld [vmem:[%s522_s28 + $0x8] sm:$0xff]  ;;  %v567_v47 = vld [vmem:[%s2085_s5 + $0x10] sm:$0xff] }
  0x29   : > { %559 = vmatpush.msra.mxu3 %v528_v15  ;;  %v658_v42 = vld [vmem:[%s522_s28] sm:$0xff]  ;;  %v570_v46 = vld [vmem:[%s2085_s5 + $0x28] sm:$0xff]  ;;  %v568_v48 = vld [vmem:[%s2085_s5 + $0x18] sm:$0xff]  ;;  %s1837_s28 = scalar_lea.vmem [#allocation2], %s1322_s18 }
  0x2a   : > { %1327 = vmatmul.msk.f32.vlgmr.msra.gmra.mxu3 %vm540_vm0, %v527_v17  ;;  %610 = vmatpush.msra.mxu1 %v581_v26  ;;  %v569_v45 = vld [vmem:[%s2085_s5 + $0x20] sm:$0xff]  ;;  %v566_v50 = vld [vmem:[%s2085_s5 + $0x8] sm:$0xff]  ;;  %v675_v51 = vld [vmem:[%s2087_s7 + $0x78] sm:$0xff] }
  0x2b   : > { %696 = vmatpush.msrb.mxu3 %v674_v19  ;;  %630 = vmatpush.msra.mxu2 %v582_v27  ;;  %v565_v49 = vld [vmem:[%s2085_s5] sm:$0xff]  ;;  %v673_v52 = vld [vmem:[%s2087_s7 + $0x68] sm:$0xff]  ;;  %v671_v53 = vld [vmem:[%s2087_s7 + $0x58] sm:$0xff] }
  0x2c   : > { %611 = vmatpush.msra.mxu1 %v579_v29  ;;  %719 = vmatpush.msra.mxu0 %v675_v51  ;;  %v669_v54 = vld [vmem:[%s2087_s7 + $0x48] sm:$0xff]  ;;  %v667_v55 = vld [vmem:[%s2087_s7 + $0x38] sm:$0xff]  ;;  %v1417_v59 = vld [vmem:[%s2084_s4] ss:$0 sm:$0xff] }
  0x2d   : > { %697 = vmatpush.msrb.mxu3 %v672_v22  ;;  %631 = vmatpush.msra.mxu2 %v580_v30  ;;  %v665_v56 = vld [vmem:[%s2087_s7 + $0x28] sm:$0xff]  ;;  %v663_v57 = vld [vmem:[%s2087_s7 + $0x18] sm:$0xff]  ;;  %v676_v0 = vld [vmem:[%s2088_s8] sm:$0x3] }
  0x2e   : > { %612 = vmatpush.msra.mxu1 %v577_v32  ;;  %720 = vmatpush.msra.mxu0 %v673_v52  ;;  %v661_v58 = vld [vmem:[%s2087_s7 + $0x8] sm:$0xff]  ;;  %v678_v1 = vperm.slane %v676_v0, 0  ;;  %v1850_v5 = vld [vmem:[%s2086_s6] sm:$0x3]  ;;  %v679_v10 = vperm.slane %v676_v0, 1 }
  0x2f   : > { %698 = vmatpush.msrb.mxu3 %v670_v25  ;;  %632 = vmatpush.msra.mxu2 %v578_v33  ;;  %v599_v6 = vperm.slane %v1850_v5, 0 }
  0x30   : > { %613 = vmatpush.msra.mxu1 %v575_v35  ;;  %721 = vmatpush.msra.mxu0 %v671_v53 }
  0x31   : > { %699 = vmatpush.msrb.mxu3 %v668_v28  ;;  %633 = vmatpush.msra.mxu2 %v576_v36 }
  0x32   : > { %614 = vmatpush.msra.mxu1 %v573_v38  ;;  %722 = vmatpush.msra.mxu0 %v669_v54 }
  0x33   : > { %700 = vmatpush.msrb.mxu3 %v666_v31  ;;  %634 = vmatpush.msra.mxu2 %v574_v39 }
  0x34   : > { %615 = vmatpush.msra.mxu1 %v571_v41  ;;  %723 = vmatpush.msra.mxu0 %v667_v55 }
  0x35   : > { %701 = vmatpush.msrb.mxu3 %v664_v34  ;;  %635 = vmatpush.msra.mxu2 %v572_v43 }
  0x36   : > { %616 = vmatpush.msra.mxu1 %v569_v45  ;;  %724 = vmatpush.msra.mxu0 %v665_v56 }
  0x37   : > { %702 = vmatpush.msrb.mxu3 %v662_v37  ;;  %636 = vmatpush.msra.mxu2 %v570_v46 }
  0x38   : > { %617 = vmatpush.msra.mxu1 %v567_v47  ;;  %725 = vmatpush.msra.mxu0 %v663_v57 }
  0x39   : > { %703 = vmatpush.msrb.mxu3 %v660_v40  ;;  %637 = vmatpush.msra.mxu2 %v568_v48 }
  0x3a   : > { %1328 = vmatmul.msk.f32.vlgmr.msrb.gmra.mxu3 %vm540_vm0, %v658_v42  ;;  %618 = vmatpush.msra.mxu1 %v565_v49 }
  0x3b   : > { %638 = vmatpush.msra.mxu2 %v566_v50  ;;  %726 = vmatpush.msra.mxu0 %v661_v58 }
  0x3c   : > { %1330 = vmatmul.msk.f32.vlgmr.msra.gmra.mxu0 %vm540_vm0, %v658_v42 }
  0x42   : > { %1329 = vmatmul.msk.f32.gmra.mxu3 %vm540_vm0, %v659_v44 }
  0x44   : > { %1331 = vmatmul.msk.f32.gmra.mxu0 %vm540_vm0, %v659_v44 }
  0xad   : > { %v561_v60 = vpop.f32.mrf.mxu3 }
  0xae   : > { %v562_v61 = vadd.f32 %v1417_v59, %v561_v60 }
  0xb0   : > { %v564_v62 = vmax.f32 %v562_v61, 0.0  ;;  %v1891_v61 = vld [vmem:[%s526_s29] sm:$0xff]  ;;  %s1513_s29 = smov 112  }
  0xb2   : > { %1216 = vst [vmem:[%s1837_s28] sm:$0xff] %v564_v62  ;;  %619 = vmatmul.f32.vlgmr.msra.gmra.mxu1 %v564_v62  ;;  %639 = vmatmul.f32.vlgmr.msra.gmra.mxu2 %v564_v62 }
  0xb9   : > { %v728_v7 = vpop.f32.mrf.mxu0 }
  0xba   : > { %v729_v13 = vadd.f32 %v728_v7, %v679_v10 }
  0xbd   : > { %v705_v63 = vpop.f32.mrf.mxu3 }
  0xbe   : > { %v706_v4 = vadd.f32 %v705_v63, %v678_v1 }
  0xc1   : > { %v731_v12 = vpop.f32.mrf.mxu0 }
  0xc2   : > { %v732_v14 = vadd.f32 %v731_v12, %v679_v10 }
  0xc4   : > { %795 = vmatpush.msrb.mxu2 %v732_v14  ;;  %v1402_v47 = vpack.i.bf16 %v729_v13, %v732_v14 }
  0xc5   : > { %v708_v2 = vpop.f32.mrf.mxu3 }
  0xc6   : > { %v709_v3 = vadd.f32 %v708_v2, %v678_v1  ;;  %796 = vmatpush.msrb.mxu2 %v729_v13 }
  0xc8   : > { %805 = vrot.lane.b32.xlu1 %v709_v3, %s1509_s21  ;;  %1332 = vmatpush.xpose.msk.msra.mxu3 %vm735_vm1, %v709_v3 }
  0xcc   : > { %1333 = vmatpush.xpose.msk.msra.mxu3 %vm735_vm1, %v706_v4 }
  0xd0   : > { %803 = vrot.lane.b32.xlu1 %v706_v4, %s1509_s21 }
 0x12f   : > { %v620_v8 = vpop.f32.mrf.mxu1 }
 0x130   : > { %v621_v9 = vadd.f32 %v620_v8, %v599_v6 }
 0x132   : > { %v734_v11 = vmul.f32 0.17677669, %v621_v9 }
 0x134   : > { %949 = vrot.lane.b32.xlu1 %v734_v11, %s2106_s24  ;;  %801 = vrot.lane.b32.xlu2 %v734_v11, %s1509_s21 }
 0x135   : > { %1334 = vmatmul.msk.f32.vlgmr.msra.gmra.mxu3 %vm735_vm1, %v734_v11  ;;  %v1874_v36 = vpop.f32.mrf.mxu2 }
 0x13a   : > { %v806_v15 = vpop.permute.xlu1 %805 }
 0x13b   : > { %1336 = vmatpush.xpose.msk.msra.mxu2 %vm735_vm1, %v806_v15 }
 0x13c   : > { %878 = vrot.lane.b32.xlu1 %v706_v4, %s1511_s30  ;;  %953 = vrot.lane.b32.xlu2 %v709_v3, %s2106_s24 }
 0x142   : > { %v804_v16 = vpop.permute.xlu1 %803 }
 0x143   : > { %1337 = vmatpush.xpose.msk.msra.mxu2 %vm735_vm1, %v804_v16 }
 0x144   : > { %880 = vrot.lane.b32.xlu2 %v709_v3, %s1511_s30 }
 0x14c   : > { %876 = vrot.lane.b32.xlu2 %v734_v11, %s1511_s30 }
 0x18e   : > { %v802_v17 = vpop.permute.xlu2 %801 }
 0x196   : > { %v954_v18 = vpop.permute.xlu2 %953 }
 0x19e   : > { %v881_v19 = vpop.permute.xlu2 %880 }
 0x19f   : > { %1340 = vmatpush.xpose.msk.msrb.mxu0 %vm735_vm1, %v881_v19 }
 0x1a6   : > { %v950_v20 = vpop.permute.xlu1 %949  ;;  %v877_v22 = vpop.permute.xlu2 %876 }
 0x1ae   : > { %v879_v21 = vpop.permute.xlu1 %878 }
 0x1af   : > { %1341 = vmatpush.xpose.msk.msrb.mxu0 %vm735_vm1, %v879_v21 }
 0x1b2   : > { %1342 = vmatmul.msk.f32.vlgmr.msrb.gmra.mxu0 %vm735_vm1, %v877_v22 }
 0x1b8   : > { %v762_v23 = vpop.f32.mrf.mxu3 }
 0x1b9   : > { %v766_v24 = vsel %vm765_vm2, %v762_v23, -inf }
 0x1ba   : > { %767 = vmax.xlane.f32.xlu0 %v766_v24 }
 0x22d   : > { %v768_v25 = vpop.xlane.xlu0 %767 }
 0x22e   : > { %v769_v26 = vsub.f32 %v762_v23, %v768_v25 }
 0x22f   : > { %v905_v30 = vpop.f32.mrf.mxu0 }
 0x230   : > { %v770_v27 = vmul.f32 1.442695, %v769_v26  ;;  %v908_v31 = vsel %vm765_vm2, %v905_v30, -inf }
 0x232   : > { %1421 = vpow2.f32 %v770_v27  ;;  %v1053_v27 = vld [vmem:[%s2089_s9 + $0x78] sm:$0xff] }
 0x233   : > { %1058 = vmatpush.msra.mxu0 %v1053_v27 }
 0x238   : > { %v1422_v28 = vpop.eup %1421 }
 0x239   : > { %v772_v29 = vsel %vm765_vm2, %v1422_v28, 0.0 }
 0x23a   : > { %773 = vadd.xlane.f32.xlu0 %v772_v29  ;;  %v1051_v29 = vld [vmem:[%s2089_s9 + $0x68] sm:$0xff] }
 0x24e   : > { %951 = vrot.lane.b32.xlu0 %v706_v4, %s2106_s24 }
 0x278   : > { %909 = vmax.xlane.f32.xlu0 %v908_v31 }
 0x2ad   : > { %v774_v32 = vpop.xlane.xlu0 %773 }
 0x2ae   : > { %1423 = vrcp.f32 %v774_v32 }
 0x2b4   : > { %v1424_v33 = vpop.eup %1423 }
 0x2b5   : > { %v776_v34 = vmul.f32 %v1424_v33, %v1422_v28 }
 0x2b7   : > { %1335 = vmatmul.msk.f32.vlgmr.msrb.gmra.mxu2 %vm765_vm2, %v776_v34 }
 0x2b8   : > { %1344 = vmatpush.xpose.msk.msrb.mxu2 %vm735_vm1, %v954_v18 }
 0x2bf   : > { %1338 = vmatmul.msk.f32.vlgmr.msra.gmra.mxu2 %vm735_vm1, %v802_v17  ;;  %v600_v17 = vperm.slane %v1850_v5, 1  ;;  %v1052_v5 = vld [vmem:[%s2089_s9 + $0x70] sm:$0xff] }
 0x2c0   : > { %v952_v35 = vpop.permute.xlu0 %951  ;;  %1059 = vmatpush.msra.mxu0 %v1052_v5 }
 0x2c1   : > { %1345 = vmatpush.xpose.msk.msrb.mxu2 %vm735_vm1, %v952_v35  ;;  %v1901_v18 = vadd.f32 %v1874_v36, %v600_v17  ;;  %v1419_v17 = vld [vmem:[%s2092_s12] ss:$0 sm:$0xff] }
 0x2c2   : > { %1060 = vmatpush.msra.mxu0 %v1051_v29 }
 0x2c3   : > { %v644_v19 = vmin.f32 %v1901_v18, 20.0  ;;  %vm643_vm4 = vcmp.gt.f32.partialorder %v1901_v18, 20.0 }
 0x2c7   : > { %1346 = vmatmul.msk.f32.vlgmr.msrb.gmra.mxu2 %vm735_vm1, %v950_v20  ;;  %v645_v20 = vmul.f32 1.442695, %v644_v19 }
 0x2eb   : > { %v910_v38 = vpop.xlane.xlu0 %909 }
 0x2ec   : > { %v911_v39 = vsub.f32 %v905_v30, %v910_v38 }
 0x2ee   : > { %v912_v42 = vmul.f32 1.442695, %v911_v39 }
 0x2f0   : > { %1425 = vpow2.f32 %v912_v42  ;;  %v1048_v42 = vld [vmem:[%s2089_s9 + $0x50] sm:$0xff] }
 0x2f6   : > { %v1426_v45 = vpop.eup %1425 }
 0x2f7   : > { %v914_v46 = vsel %vm765_vm2, %v1426_v45, 0.0 }
 0x33a   : > { %v1876_v37 = vpop.f32.mrf.mxu2 }
 0x342   : > { %v830_v40 = vpop.f32.mrf.mxu2 }
 0x343   : > { %v833_v41 = vsel %vm765_vm2, %v830_v40, -inf }
 0x344   : > { %834 = vmax.xlane.f32.xlu1 %v833_v41  ;;  %v1049_v41 = vld [vmem:[%s2089_s9 + $0x58] sm:$0xff] }
 0x34a   : > { %v978_v43 = vpop.f32.mrf.mxu2 }
 0x34b   : > { %v981_v44 = vsel %vm765_vm2, %v978_v43, -inf }
 0x34c   : > { %982 = vmax.xlane.f32.xlu2 %v981_v44  ;;  %v1046_v44 = vld [vmem:[%s2089_s9 + $0x40] sm:$0xff] }
 0x354   : > { %915 = vadd.xlane.f32.xlu2 %v914_v46  ;;  %v1044_v46 = vld [vmem:[%s2089_s9 + $0x30] sm:$0xff] }
 0x35d   : > { %1403 = vrot.lane.b32.xlu1 %v1402_v47, %s1509_s21 }
 0x3b7   : > { %v835_v48 = vpop.xlane.xlu1 %834 }
 0x3b8   : > { %v836_v49 = vsub.f32 %v830_v40, %v835_v48  ;;  %v1050_v40 = vld [vmem:[%s2089_s9 + $0x60] sm:$0xff] }
 0x3b9   : > { %1061 = vmatpush.msra.mxu0 %v1050_v40  ;;  %v1042_v48 = vld [vmem:[%s2089_s9 + $0x20] sm:$0xff] }
 0x3ba   : > { %v837_v50 = vmul.f32 1.442695, %v836_v49  ;;  %v1041_v49 = vld [vmem:[%s2089_s9 + $0x18] sm:$0xff] }
 0x3bb   : > { %1062 = vmatpush.msra.mxu0 %v1049_v41 }
 0x3bc   : > { %1427 = vpow2.f32 %v837_v50  ;;  %v1040_v50 = vld [vmem:[%s2089_s9 + $0x10] sm:$0xff] }
 0x3bd   : > { %1063 = vmatpush.msra.mxu0 %v1048_v42 }
 0x3bf   : > { %v983_v51 = vpop.xlane.xlu2 %982 }
 0x3c0   : > { %v984_v52 = vsub.f32 %v978_v43, %v983_v51  ;;  %v1047_v43 = vld [vmem:[%s2089_s9 + $0x48] sm:$0xff] }
 0x3c1   : > { %1064 = vmatpush.msra.mxu0 %v1047_v43  ;;  %v1039_v51 = vld [vmem:[%s2089_s9 + $0x8] sm:$0xff]  ;;  %v1420_v43 = vld [vmem:[%s2094_s14] ss:$0 sm:$0xff] }
 0x3c2   : > { %v1428_v53 = vpop.eup %1427  ;;  %v985_v54 = vmul.f32 1.442695, %v984_v52  ;;  %v1038_v52 = vld [vmem:[%s2089_s9] sm:$0xff] }
 0x3c3   : > { %v839_v55 = vsel %vm765_vm2, %v1428_v53, 0.0  ;;  %1065 = vmatpush.msra.mxu0 %v1046_v44 }
 0x3c4   : > { %1429 = vpow2.f32 %v985_v54  ;;  %840 = vadd.xlane.f32.xlu2 %v839_v55  ;;  %v1094_v54 = vld [vmem:[%s2091_s11 + $0x70] sm:$0xff]  ;;  %v1093_v55 = vld [vmem:[%s2091_s11 + $0x68] sm:$0xff] }
 0x3c7   : > { %v916_v62 = vpop.xlane.xlu2 %915 }
 0x3c8   : > { %1431 = vrcp.f32 %v916_v62  ;;  %v1087_v62 = vld [vmem:[%s2091_s11 + $0x38] sm:$0xff] }
 0x3ca   : > { %v1430_v56 = vpop.eup %1429 }
 0x3cb   : > { %v987_v57 = vsel %vm765_vm2, %v1430_v56, 0.0 }
 0x3cc   : > { %988 = vadd.xlane.f32.xlu0 %v987_v57  ;;  %v1091_v57 = vld [vmem:[%s2091_s11 + $0x58] sm:$0xff] }
 0x3ce   : > { %v1432_v0 = vpop.eup %1431 }
 0x3cf   : > { %v1404_v58 = vpop.permute.xlu1 %1403  ;;  %v918_v7 = vmul.f32 %v1432_v0, %v1426_v45  ;;  %v1045_v45 = vld [vmem:[%s2089_s9 + $0x38] sm:$0xff]  ;;  %v1085_v0 = vld [vmem:[%s2091_s11 + $0x28] sm:$0xff] }
 0x3d0   : > { %v1405_v59 = vunpack.i.l.bf16 %v1404_v58  ;;  %v1406_v60 = vunpack.i.h.bf16 %v1404_v58  ;;  %1066 = vmatpush.msra.mxu0 %v1045_v45  ;;  %v1090_v58 = vld [vmem:[%s2091_s11 + $0x50] sm:$0xff] }
 0x3d2   : > { %870 = vmatpush.msrb.mxu3 %v1405_v59  ;;  %1067 = vmatpush.msra.mxu0 %v1044_v46  ;;  %v1089_v59 = vld [vmem:[%s2091_s11 + $0x48] sm:$0xff] }
 0x3d4   : > { %871 = vmatpush.msrb.mxu3 %v1406_v60  ;;  %v1088_v60 = vld [vmem:[%s2091_s11 + $0x40] sm:$0xff] }
 0x3dc   : > { %1413 = vrot.lane.b32.xlu2 %v1402_v47, %s1511_s30 }
 0x3e0   : > { %1408 = vrot.lane.b32.xlu0 %v1402_v47, %s2106_s24  ;;  %v1043_v47 = vld [vmem:[%s2089_s9 + $0x28] sm:$0xff] }
 0x3e1   : > { %1068 = vmatpush.msra.mxu0 %v1043_v47 }
 0x3e3   : > { %1069 = vmatpush.msra.mxu0 %v1042_v48 }
 0x3e4   : > { %1137 = vrot.lane.b32.xlu2 %v1891_v61, %s1512_s20  ;;  %s1514_s20 = smov 48  }
 0x3e5   : > { %1070 = vmatpush.msra.mxu0 %v1041_v49 }
 0x3e7   : > { %1071 = vmatpush.msra.mxu0 %v1040_v50 }
 0x3e9   : > { %1072 = vmatpush.msra.mxu0 %v1039_v51 }
 0x3eb   : > { %1073 = vmatpush.msra.mxu0 %v1038_v52 }
 0x437   : > { %v841_v63 = vpop.xlane.xlu2 %840 }
 0x438   : > { %1433 = vrcp.f32 %v841_v63  ;;  %v1086_v63 = vld [vmem:[%s2091_s11 + $0x30] sm:$0xff] }
 0x43e   : > { %v1434_v1 = vpop.eup %1433 }
 0x43f   : > { %v843_v2 = vmul.f32 %v1434_v1, %v1428_v53  ;;  %v1414_v3 = vpop.permute.xlu2 %1413  ;;  %v989_v4 = vpop.xlane.xlu0 %988  ;;  %v1095_v53 = vld [vmem:[%s2091_s11 + $0x78] sm:$0xff]  ;;  %v1084_v1 = vld [vmem:[%s2091_s11 + $0x20] sm:$0xff] }
 0x440   : > { %1435 = vrcp.f32 %v989_v4  ;;  %v1415_v6 = vunpack.i.l.bf16 %v1414_v3  ;;  %v1416_v9 = vunpack.i.h.bf16 %v1414_v3  ;;  %v1083_v3 = vld [vmem:[%s2091_s11 + $0x18] sm:$0xff] }
 0x441   : > { %1339 = vmatmul.msk.f32.vlgmr.msrb.gmra.mxu3 %vm765_vm2, %v843_v2  ;;  %v844_v8 = vadd.f32 %v843_v2, %v776_v34  ;;  %1437 = vpow2.f32 %v645_v20 }
 0x442   : > { %943 = vmatpush.msrb.mxu1 %v1415_v6 }
 0x443   : > { %v919_v10 = vadd.f32 %v918_v7, %v844_v8 }
 0x444   : > { %944 = vmatpush.msrb.mxu1 %v1416_v9 }
 0x445   : > { %1343 = vmatmul.msk.f32.vlgmr.msrb.gmra.mxu1 %vm765_vm2, %v918_v7 }
 0x446   : > { %v1436_v11 = vpop.eup %1435  ;;  %1100 = vmatpush.msra.mxu1 %v1095_v53 }
 0x447   : > { %v991_v12 = vmul.f32 %v1436_v11, %v1430_v56  ;;  %v1438_v21 = vpop.eup %1437  ;;  %v1138_v35 = vpop.permute.xlu2 %1137  ;;  %v1092_v56 = vld [vmem:[%s2091_s11 + $0x60] sm:$0xff]  ;;  %v1081_v11 = vld [vmem:[%s2091_s11 + $0x8] sm:$0xff] }
 0x448   : > { %v647_v22 = vadd.f32 1.0, %v1438_v21  ;;  %v650_v23 = vmul.f32 -0.5, %v1438_v21  ;;  %v653_v26 = vand.u32 2147483647, %v1438_v21  ;;  %1101 = vmatpush.msra.mxu1 %v1094_v54 }
 0x449   : > { %v1896_v13 = vadd.f32 %v991_v12, %v919_v10  ;;  %v1082_v10 = vld [vmem:[%s2091_s11 + $0x10] sm:$0xff] }
 0x44a   : > { %1439 = vlog2.f32 %v647_v22  ;;  %v651_v25 = vadd.f32 1.0, %v650_v23  ;;  %vm654_vm3 = vcmp.lt.f32.partialorder %v653_v26, 0.0004427343  ;;  %1102 = vmatpush.msra.mxu1 %v1093_v55 }
 0x44c   : > { %v652_v30 = vmul.f32 %v1438_v21, %v651_v25  ;;  %1103 = vmatpush.msra.mxu1 %v1092_v56 }
 0x44e   : > { %1104 = vmatpush.msra.mxu1 %v1091_v57 }
 0x450   : > { %v1440_v24 = vpop.eup %1439  ;;  %1105 = vmatpush.msra.mxu1 %v1090_v58 }
 0x451   : > { %v649_v28 = vmul.f32 0.6931472, %v1440_v24 }
 0x452   : > { %v1409_v14 = vpop.permute.xlu0 %1408  ;;  %1106 = vmatpush.msra.mxu1 %v1089_v59 }
 0x453   : > { %v1410_v15 = vunpack.i.l.bf16 %v1409_v14  ;;  %v1411_v16 = vunpack.i.h.bf16 %v1409_v14  ;;  %v655_v31 = vsel %vm654_vm3, %v652_v30, %v649_v28 }
 0x454   : > { %v1916_v33 = vsel %vm643_vm4, %v1901_v18, %v655_v31  ;;  %1107 = vmatpush.msra.mxu1 %v1088_v60 }
 0x455   : > { %1016 = vmatpush.msra.mxu3 %v1410_v15  ;;  %v657_v36 = vmax.f32 %v1916_v33, 0.0 }
 0x456   : > { %1108 = vmatpush.msra.mxu1 %v1087_v62 }
 0x457   : > { %1017 = vmatpush.msra.mxu3 %v1411_v16  ;;  %v1140_v38 = vmul.f32 %v1138_v35, %v657_v36  ;;  %v1078_v35 = vmul.f32 0.25, %v1896_v13 }
 0x458   : > { %1347 = vmatmul.msk.f32.vlgmr.msra.gmra.mxu3 %vm765_vm2, %v991_v12  ;;  %1109 = vmatpush.msra.mxu1 %v1086_v63  ;;  %v1418_v12 = vld [vmem:[%s2090_s10] ss:$0 sm:$0xff] }
 0x45a   : > { %1110 = vmatpush.msra.mxu1 %v1085_v0 }
 0x45c   : > { %1111 = vmatpush.msra.mxu1 %v1084_v1 }
 0x45e   : > { %1112 = vmatpush.msra.mxu1 %v1083_v3 }
 0x460   : > { %1113 = vmatpush.msra.mxu1 %v1082_v10 }
 0x462   : > { %1114 = vmatpush.msra.mxu1 %v1081_v11 }
 0x4c2   : > { %v946_v32 = vpop.f32.mrf.mxu1 }
 0x4c3   : > { %1027 = vrot.lane.b32.xlu0 %v946_v32, %s1511_s30 }
 0x4c4   : > { %v873_v34 = vpop.f32.mrf.mxu3 }
 0x4c5   : > { %1023 = vrot.lane.b32.xlu1 %v873_v34, %s2106_s24  ;;  %s1355_s24 = sshll.u32 %s1617_s22, 4  ;;  %s2121_s22 = sand.u32 1, %s1499_s19  }
 0x4c6   : > { %s1230_s27 = scalar_lea.hbm %s2095_s15, %s1355_s24  ;;  %s1219_s23 = scalar_lea.sflag [#allocation3], %s2121_s22 }
 0x4c7   : > { %s1234_s26 = sshll.u32 %s1230_s27, 4  ;;  %s1465_s24 = scalar_lea.hbm %s2095_s15, 32  ;;  %s1235_s26 = int_to_ptr.hbm [resolvable:$true] %s1234_s26 }
 0x4c8   : > { %s1459_s16 = sshra.s32 %s1235_s26, 4  ;;  %s1460_s16 = int_to_ptr.hbm [resolvable:$true] %s1459_s16 }
 0x4c9   : > { %p1466_p0 = scmp.lt.s32.totalorder %s1460_s16, %s2095_s15 }
 0x4cb   : > { %1142 = vrot.lane.b32.xlu0 %v1140_v38, %s1513_s29  ;;  %v1155_v38 = vld [vmem:[%s2093_s13 + $0x8] sm:$0xff] }
 0x4cc   : > { %1177 = vmatpush.msra.mxu2 %v1155_v38 }
 0x4d3   : > { %1188 = vrot.lane.b32.xlu0 %v1901_v18, %s1514_s20 }
 0x4db   : > { %v1019_v39 = vpop.f32.mrf.mxu3 }
 0x4dc   : > { %1031 = vrot.lane.b32.xlu1 %v1019_v39, %s1509_s21  ;;  %v1154_v39 = vld [vmem:[%s2093_s13] sm:$0xff] }
 0x4dd   : > { %1178 = vmatpush.msra.mxu2 %v1154_v39 }
 0x535   : > { %v1028_v6 = vpop.permute.xlu0 %1027 }
 0x537   : > { %v1024_v2 = vpop.permute.xlu1 %1023 }
 0x538   : > { %v1034_v4 = vsel %vm735_vm1, %v1876_v37, %v1024_v2  ;;  %v1080_v37 = vld [vmem:[%s2091_s11] sm:$0xff] }
 0x539   : > { %v1035_v7 = vsel %vm540_vm0, %v1034_v4, %v1028_v6  ;;  %1115 = vmatpush.msra.mxu1 %v1080_v37 }
 0x54e   : > { %v1032_v8 = vpop.permute.xlu1 %1031 }
 0x54f   : > { %v1037_v9 = vsel %vm1036_vm5, %v1035_v7, %v1032_v8 }
 0x550   : > { %1074 = vmatmul.f32.vlgmr.msra.gmra.mxu0 %v1037_v9 }
 0x5cd   : > { %v1075_v14 = vpop.f32.mrf.mxu0 }
 0x5ce   : > { %v1076_v15 = vadd.f32 %v1418_v12, %v1075_v14 }
 0x5d0   : > { %v1079_v16 = vmax.f32 %v1076_v15, 0.0 }
 0x5d2   : > { %1116 = vmatmul.f32.vlgmr.msra.gmra.mxu1 %v1079_v16 }
 0x64f   : > { %v1117_v19 = vpop.f32.mrf.mxu1 }
 0x650   : > { %v1118_v20 = vadd.f32 %v1419_v17, %v1117_v19 }
 0x652   : > { %v1121_v21 = vmin.f32 %v1118_v20, 20.0  ;;  %vm1120_vm7 = vcmp.gt.f32.partialorder %v1118_v20, 20.0 }
 0x654   : > { %v1122_v22 = vmul.f32 1.442695, %v1121_v21 }
 0x656   : > { %1441 = vpow2.f32 %v1122_v22 }
 0x65c   : > { %v1442_v23 = vpop.eup %1441 }
 0x65d   : > { %v1124_v24 = vadd.f32 1.0, %v1442_v23  ;;  %v1127_v25 = vmul.f32 -0.5, %v1442_v23  ;;  %v1130_v27 = vand.u32 2147483647, %v1442_v23 }
 0x65f   : > { %1443 = vlog2.f32 %v1124_v24  ;;  %v1128_v26 = vadd.f32 1.0, %v1127_v25  ;;  %vm1131_vm6 = vcmp.lt.f32.partialorder %v1130_v27, 0.0004427343 }
 0x661   : > { %v1129_v29 = vmul.f32 %v1442_v23, %v1128_v26 }
 0x665   : > { %v1444_v5 = vpop.eup %1443 }
 0x666   : > { %v1126_v28 = vmul.f32 0.6931472, %v1444_v5 }
 0x668   : > { %v1132_v30 = vsel %vm1131_vm6, %v1129_v29, %v1126_v28 }
 0x669   : > { %v1133_v31 = vsel %vm1120_vm7, %v1118_v20, %v1132_v30 }
 0x66a   : > { %v1134_v32 = vmax.f32 %v1133_v31, 0.0 }
 0x66c   : > { %1200 = vrot.lane.b32.xlu0 %v1134_v32, %s1515_s25  ;;  %v1147_v34 = vmul.f32 %v1891_v61, %v1134_v32  ;;  %v1143_v61 = vpop.permute.xlu0 %1142 }
 0x66d   : > { %v1145_v40 = vadd.f32 %v1143_v61, %v1901_v18 }
 0x66e   : > { %1149 = vrot.lane.b32.xlu1 %v1147_v34, %s1513_s29 }
 0x674   : > { %v1189_v45 = vpop.permute.xlu0 %1188 }
 0x676   : > { %1192 = vrot.lane.b32.xlu1 %v657_v36, %s1514_s20  ;;  %v1146_v36 = vmul.f32 0.0, %v1145_v40  ;;  %s2119_s20 = smov 32  }
 0x67e   : > { %1204 = vrot.lane.b32.xlu1 %v1078_v35, %s1513_s29 }
 0x6de   : > { %v1201_v52 = vpop.permute.xlu0 %1200 }
 0x6e0   : > { %v1150_v33 = vpop.permute.xlu1 %1149 }
 0x6e1   : > { %v1152_v41 = vadd.f32 %v1150_v33, %v1118_v20 }
 0x6e3   : > { %v1153_v13 = vadd.f32 %v1152_v41, %v1146_v36 }
 0x6e5   : > { %1184 = vrot.lane.b32.xlu2 %v1153_v13, %s2119_s20  ;;  %1348 = vmatmul.msk.f32.vlgmr.msra.gmra.mxu2 %vm765_vm2, %v1153_v13  ;;  %s1461_s20 = scalar_lea.hbm %s1460_s16, 16 }
 0x6e6   : > { %p1462_p11 = scmp.ne.s32.totalorder %s1460_s16, %s1461_s20  ;;  %p1467_p1 = scmp.lt.s32.totalorder %s1465_s24, %s1461_s20 }
 0x6e8   : > { %v1193_v44 = vpop.permute.xlu1 %1192  ;;  %p1463_p12 = pnand %p1462_p11, %p1634_p5  ;;  %p1468_p2 = por %p1467_p1, %p1466_p0 }
 0x6ea   : > { %p1464_p13 = pneg %p1463_p12 }
 0x6ec   : > { %p1469_p3 = pnand %p1468_p2, %p1464_p13 }
 0x6ed   : > { %1196 = vrot.lane.b32.xlu2 %v1118_v20, %s1515_s25  ;;  %s1232_s25 = sshll.u32 %s1837_s28, 4  ;;  %s1233_s25 = int_to_ptr.vmem [resolvable:$true] %s1232_s25 }
 0x6f0   : > { %v1205_v54 = vpop.permute.xlu1 %1204 }
 0x73f   : > { %v1185_v42 = vpop.permute.xlu2 %1184 }
 0x747   : > { %v1197_v50 = vpop.permute.xlu2 %1196 }
 0x768   : > { %v1180_v46 = vpop.f32.mrf.mxu2 }
 0x769   : > { %v1181_v18 = vadd.f32 %v1420_v43, %v1180_v46 }
 0x76b   : > { %v1183_v47 = vmax.f32 %v1181_v18, 0.0 }
 0x76d   : > { %v1207_v48 = vsel %vm735_vm1, %v1183_v47, %v1185_v42 }
 0x76e   : > { %v1209_v49 = vsel %vm1208_vm8, %v1207_v48, %v1189_v45 }
 0x76f   : > { %v1210_v51 = vsel %vm540_vm0, %v1209_v49, %v1193_v44 }
 0x770   : > { %v1212_v53 = vsel %vm1211_vm9, %v1210_v51, %v1197_v50 }
 0x771   : > { %v1213_v55 = vsel %vm1036_vm5, %v1212_v53, %v1201_v52 }
 0x772   : > { %v1215_v56 = vsel %vm1214_vm10, %v1213_v55, %v1205_v54 }
 0x773   : > { %1217 = vst [vmem:[%s1837_s28 + $0x8] sm:$0xff] %v1215_v56 }
 0x774   : > { %1472 = shalt.err (!%p1469_p3)
}
 0x775   : > { %1356 = dma.vmem_to_hbm [thread:$0]  (%p1634_p5), %s1233_s25, 256, %s1235_s26, %s1219_s23  }
 0x776 PF: > { %s2122_s28 = sld [smem:[#allocation7_spill]] }
 0x777   : > { %s2123_s27 = sld [smem:[#allocation5_spill]] }
 0x77c   : > { %p1362_p4 = scmp.ge.s32.totalorder %s2122_s28, 2 }
 0x77d   : > { %s1246_s0 = sand.u32 1, %s2123_s27  }
 0x77e   : > { %p1359_p7 = pnand %p1362_p4, %p1638_p6  ;;  %s1247_s29 = scalar_lea.sflag [#allocation3], %s1246_s0 }
 0x780   : > { %p1360_p8 = pneg %p1359_p7 }
 0x782   : > { %1490 = dma.done.wait (%p1360_p8), %s1247_s29, 256  }
 0x783   : > { %1492 = vsyncadd (%p1360_p8), %s1247_s29, 4294967040  ;;  %s2125_s21 = sld [smem:[#allocation8_spill]]  ;;  %s2128_s18 = smov %s1499_s19 }
 0x784   : > { %s2126_s16 = sld [smem:[#allocation6_spill]] }
 0x785   : > { %s2127_s20 = sld [smem:[#allocation9_spill]] }
 0x789   : > { %p25_p9 = scmp.ge.s32.totalorder %s2125_s21, 4  }
 0x78a   : > { %s2129_s19 = smov %s2126_s16 }
 0x78b   :  { %27 = sbr.rel (!%p25_p9) target bundleno = 5 (0x5), region = 121 }
 0x790   :  { %1253 = vsyncpa [#allocation3], 1 }
 0x791   :  { %1255 = vsyncpa [#allocation3 + $0x1], 1 }

</bundles_post_ra>
